<compile_context>
chip_gen: v5e
topology: v5e:2x2
jax: 0.10.0
libtpu: 0.0.40
codegen_flags: <defaults>
</compile_context>

<pallas_src>
import numpy as np
import jax
import jax.numpy as jnp
from jax.experimental import pallas as pl
from jax.experimental.pallas import tpu as pltpu

_LN2 = 0.6931471805599453


def _shifted_softplus(v):
    # Numerically stable softplus(v) - log(2); matches F.softplus (linear for large v).
    # TODO(synk): if a bundle dump shows the EUP slot binding on v6e/v7x, evaluate this
    # in bf16 there (not on v5e: no bf16 EUP/VPU).
    return jnp.maximum(v, 0.0) + jnp.log(1.0 + jnp.exp(-jnp.abs(v))) - _LN2


# ------------------------------------------------------------------------------------
# Fused interaction layer + residual stacks, tiled over atoms.
# ------------------------------------------------------------------------------------
def _interaction_kernel(x_ref, xjc_ref,
                        wi_ref, bi_ref,
                        vg_ref, vs_ref, exp_ref, fold_ref,
                        riw1_ref, rib1_ref, riw2_ref, rib2_ref,
                        wd_ref, bd_ref, u_ref,
                        raw1_ref, rab1_ref, raw2_ref, rab2_ref,
                        out_ref):
    def mm(a, w):
        # MXU matmul: cast the activation to the (pre-cast) weight dtype, f32 accumulate.
        return jnp.dot(a.astype(w.dtype), w, preferred_element_type=jnp.float32)

    x = x_ref[...]                                   # [tile_n, F]
    xa = _shifted_softplus(x)                        # dropout == identity (eval mode)
    xi = mm(xa, wi_ref[...]) + bi_ref[...]           # dense_i

    xjc = xjc_ref[...]                               # gated neighbours, [tile_n, M*F]

    # --- AtomwiseAttention ------------------------------------------------------------
    # th.bmm(xi.view(N,1,F), xj.view(N,F,M)): on the pair-concatenated layout
    # xjc[n, m*F + f] == xj[n*M + m, f], the flat view index k = m*F + f gives
    #   logits[n, m] = sum_k xi[n, k//M] * xjc[n, k] * [k % M == m]
    # which is two constant one-hot matmuls (vg: lane gather of xi, vs: slot scatter).
    xig = mm(xi, vg_ref[...])                        # xig[n, k] = xi[n, k // M]
    logits = mm(xig * xjc, vs_ref[...])              # [tile_n, M]

    lmax = jnp.max(logits, axis=-1, keepdims=True)
    p = jnp.exp(logits - lmax)
    att = p * pl.reciprocal(jnp.sum(p, axis=-1, keepdims=True), approx=True)  # EUP

    # einsum('nom,nmf->nf', att, xj.view(N,M,F)):
    #   xj_att[n, f] = sum_m att[n, m] * xjc[n, m*F + f]
    att_exp = mm(att, exp_ref[...])                  # att_exp[n, k] = att[n, k // F]
    xj_att = mm(att_exp * xjc, fold_ref[...])        # fold lanes k -> feature k % F

    # --- interaction residual stack, output dense, atom residual stack -----------------
    # Ri/Ra are small & static -> unrolled Python loops; switch to lax.fori_loop with
    # dynamic riw1_ref[r] indexing for large stacks to bound vreg pressure.
    m_vec = xi + xj_att
    for r in range(riw1_ref.shape[0]):
        y = _shifted_softplus(m_vec)
        h = mm(y, riw1_ref[r]) + rib1_ref[r]
        h = mm(h, riw2_ref[r]) + rib2_ref[r]
        m_vec = m_vec + h
    m_vec = _shifted_softplus(m_vec)

    xo = u_ref[...] * x + mm(m_vec, wd_ref[...]) + bd_ref[...]
    for r in range(raw1_ref.shape[0]):
        y = _shifted_softplus(xo)
        h = mm(y, raw1_ref[r]) + rab1_ref[r]
        h = mm(h, raw2_ref[r]) + rab2_ref[r]
        xo = xo + h
    out_ref[...] = xo


# ------------------------------------------------------------------------------------
# Parameter preparation (one-time, hoisted out of the hot path).
# ------------------------------------------------------------------------------------
def prepare_params(params, num_atoms, num_pairs, matmul_dtype=jnp.bfloat16):
    """Transpose Linear weights to [in,out] (cast to the MXU operand dtype), reshape
    biases (kept f32), and build the constant one-hot matrices realising PyTorch's
    xj.view(N, F, -1) / .view(N, -1, F) on the pair-concatenated [N, M*F] layout."""
    F = params["wi"].shape[0]
    if num_pairs % num_atoms != 0:
        raise ValueError("num_pairs must be a multiple of num_atoms (required by .view)")
    M = num_pairs // num_atoms
    MF = M * F

    k = np.arange(MF)
    vg = np.zeros((F, MF), np.float32); vg[k // M, k] = 1.0   # xig[n,k] = xi[n, k//M]
    vs = np.zeros((MF, M), np.float32); vs[k, k % M] = 1.0    # logits slot = k % M
    ex = np.zeros((M, MF), np.float32); ex[k // F, k] = 1.0   # att lane-expansion
    fd = np.zeros((MF, F), np.float32); fd[k, k % F] = 1.0    # fold pairs back to F

    f32, wdt = jnp.float32, matmul_dtype
    t = lambda a: jnp.asarray(a, f32)
    return {
        # XLA prologue (dense_j on all atoms + rbf filter)
        "k2f_t": t(params["k2f_w"]).T.astype(wdt),
        "wj_t": t(params["wj"]).T.astype(wdt),
        "bj": t(params["bj"]).reshape(1, F),
        # fused kernel weights (MXU operand dtype) and f32 biases
        "wi_t": t(params["wi"]).T.astype(wdt),
        "bi": t(params["bi"]).reshape(1, F),
        "riw1_t": jnp.transpose(t(params["riw1"]), (0, 2, 1)).astype(wdt),
        "rib1": t(params["rib1"])[:, None, :],
        "riw2_t": jnp.transpose(t(params["riw2"]), (0, 2, 1)).astype(wdt),
        "rib2": t(params["rib2"])[:, None, :],
        "wd_t": t(params["wd"]).T.astype(wdt),
        "bd": t(params["bd"]).reshape(1, F),
        "u": t(params["u"]).reshape(1, F),
        "raw1_t": jnp.transpose(t(params["raw1"]), (0, 2, 1)).astype(wdt),
        "rab1": t(params["rab1"])[:, None, :],
        "raw2_t": jnp.transpose(t(params["raw2"]), (0, 2, 1)).astype(wdt),
        "rab2": t(params["rab2"])[:, None, :],
        # constant one-hots for the .view reinterpretation (exact in bf16)
        "vg": jnp.asarray(vg, wdt),
        "vs": jnp.asarray(vs, wdt),
        "exp": jnp.asarray(ex, wdt),
        "fold": jnp.asarray(fd, wdt),
    }


# ------------------------------------------------------------------------------------
# VMEM-derived tile selection / compiler params.
# ------------------------------------------------------------------------------------
def _compiler_params():
    """Megacore-parallel atom-tile axis; vmem limit ~3/4 of the chip's physical VMEM
    (~96 MiB on v5e/v6e's 128 MiB, ~48 MiB on v7x's 64 MiB)."""
    kwargs = dict(dimension_semantics=("parallel",))
    budget = 32 * 1024 * 1024                       # conservative fallback
    try:
        cap = int(pltpu.get_tpu_info().vmem_capacity_bytes)
        budget = (cap * 3) // 4
        kwargs["vmem_limit_bytes"] = budget
    except Exception:
        pass
    return pltpu.CompilerParams(**kwargs), budget


def _choose_tile(N, F, M, Ri, Ra, wdt, vmem_budget, requested=None, min_steps=2):
    if requested is not None:
        assert N % requested == 0 and (requested % 8 == 0 or requested == N), \
            "tile_atoms must divide num_atoms and be a multiple of 8 (or == num_atoms)"
        return requested
    MF = M * F
    wb = jnp.dtype(wdt).itemsize
    # Grid-invariant operands (double-buffered by the pipeline by default; pl.Buffered(1)
    # would halve this but support varies across jax versions, so it is budgeted instead).
    fixed = 2 * wb * (F * F + F * MF + MF * M + M * MF + MF * F
                      + 2 * Ri * F * F + F * F + 2 * Ra * F * F)
    fixed += 2 * 4 * ((2 * Ri + 2 * Ra + 4) * F)      # f32 biases + u
    fixed += 2 * 1024 * 1024                          # compiler scratch headroom
    # Per-atom-row bytes: double-buffered x / xjc / out blocks + live f32 intermediates.
    per_row = 2 * 4 * (F + MF + F) + 4 * (4 * MF + 6 * F)
    cands = [t for t in range(8, N + 1, 8) if N % t == 0] or [N]
    fit = [t for t in cands if fixed + t * per_row <= vmem_budget] or cands[:1]
    # Prefer >= min_steps grid steps (keeps both v7x TensorCores busy; the extra ~0.35us
    # per step is negligible on single-TC v5e/v6e).
    multi = [t for t in fit if N // t >= min_steps]
    return max(multi) if multi else max(fit)


# ------------------------------------------------------------------------------------
# Wrapper.
# ------------------------------------------------------------------------------------
def physnet_interaction_block(x, rbf, idx_i, idx_j, prep, *, tile_atoms=None):
    del idx_i                                    # unused by the PyTorch forward pass
    N, F = x.shape
    P, K = rbf.shape
    if P % N != 0:
        raise ValueError("num_pairs must be a multiple of num_atoms (required by .view)")
    M = P // N
    MF = M * F
    Ri = prep["riw1_t"].shape[0]
    Ra = prep["raw1_t"].shape[0]
    wdt = prep["wi_t"].dtype

    # ---- XLA prologue: dense_j over all atoms, neighbour gather, rbf filter gate, and
    # reshape to the lane-dense pair-concatenated layout xjc[n, m*F + f] = xj[n*M+m, f].
    xa = _shifted_softplus(x)
    xjd = jnp.dot(xa.astype(wdt), prep["wj_t"],
                  preferred_element_type=jnp.float32) + prep["bj"]
    g = jnp.dot(rbf.astype(wdt), prep["k2f_t"], preferred_element_type=jnp.float32)
    xjc = (g * xjd[idx_j]).reshape(N, MF)

    cp, vmem_budget = _compiler_params()
    tile_n = _choose_tile(N, F, M, Ri, Ra, wdt, vmem_budget, tile_atoms)
    grid = (N // tile_n,)

    def const(shape):
        nd = len(shape)
        return pl.BlockSpec(shape, lambda i: (0,) * nd)

    out = pl.pallas_call(
        _interaction_kernel,
        grid_spec=pltpu.PrefetchScalarGridSpec(
            num_scalar_prefetch=0,
            grid=grid,
            in_specs=[
                pl.BlockSpec((tile_n, F), lambda i: (i, 0)),    # x
                pl.BlockSpec((tile_n, MF), lambda i: (i, 0)),   # gated neighbours
                const((F, F)), const((1, F)),                   # dense_i
                const((F, MF)), const((MF, M)),                 # view one-hots (logits)
                const((M, MF)), const((MF, F)),                 # view one-hots (weighted sum)
                const((Ri, F, F)), const((Ri, 1, F)),           # interaction residuals
                const((Ri, F, F)), const((Ri, 1, F)),
                const((F, F)), const((1, F)), const((1, F)),    # output dense + u
                const((Ra, F, F)), const((Ra, 1, F)),           # atom residuals
                const((Ra, F, F)), const((Ra, 1, F)),
            ],
            out_specs=pl.BlockSpec((tile_n, F), lambda i: (i, 0))),
        out_shape=jax.ShapeDtypeStruct((N, F), jnp.float32),
        compiler_params=cp,
    )(x, xjc,
      prep["wi_t"], prep["bi"],
      prep["vg"], prep["vs"], prep["exp"], prep["fold"],
      prep["riw1_t"], prep["rib1"], prep["riw2_t"], prep["rib2"],
      prep["wd_t"], prep["bd"], prep["u"],
      prep["raw1_t"], prep["rab1"], prep["raw2_t"], prep["rab2"])
    return out


# ------------------------------------------------------------------------------------
# Pure-JAX reference (mirrors the PyTorch forward exactly, all f32).
# ------------------------------------------------------------------------------------
def reference(x, rbf, idx_i, idx_j, p):
    del idx_i
    N, F = x.shape
    xa = _shifted_softplus(x)
    g = rbf @ p["k2f_w"].T
    xi = xa @ p["wi"].T + p["bi"]
    xj = g * (xa @ p["wj"].T + p["bj"])[idx_j]
    att = jnp.einsum("nof,nfm->nom", xi.reshape(N, 1, F), xj.reshape(N, F, -1))
    att = jax.nn.softmax(att, axis=-1)
    xj = jnp.einsum("nom,nmf->nf", att, xj.reshape(N, -1, F))
    m = xi + xj
    for r in range(p["riw1"].shape[0]):
        y = _shifted_softplus(m)
        m = m + (y @ p["riw1"][r].T + p["rib1"][r]) @ p["riw2"][r].T + p["rib2"][r]
    m = _shifted_softplus(m)
    xo = p["u"] * x + m @ p["wd"].T + p["bd"]
    for r in range(p["raw1"].shape[0]):
        y = _shifted_softplus(xo)
        xo = xo + (y @ p["raw1"][r].T + p["rab1"][r]) @ p["raw2"][r].T + p["rab2"][r]
    return xo


if __name__ == "__main__":
    N, F, K, M = 32, 32, 16, 4          # num_atoms, features, rbf size, pairs per atom
    P = N * M                            # num_pairs (must be divisible by N for .view)
    Ri, Ra = 2, 2                        # num_residual_interaction, num_residual_atom

    key = jax.random.PRNGKey(0)
    ks = jax.random.split(key, 20)
    x = jax.random.normal(ks[0], (N, F), jnp.float32)
    rbf = jax.random.normal(ks[1], (P, K), jnp.float32)
    idx_i = jax.random.randint(ks[2], (P,), 0, N, dtype=jnp.int32)   # unused in forward
    idx_j = jax.random.randint(ks[3], (P,), 0, N, dtype=jnp.int32)

    w = lambda k, shape: 0.1 * jax.random.normal(k, shape, jnp.float32)
    params = {
        "k2f_w": w(ks[4], (F, K)),
        "wi": w(ks[5], (F, F)), "bi": w(ks[6], (F,)),
        "wj": w(ks[7], (F, F)), "bj": w(ks[8], (F,)),
        "riw1": w(ks[9], (Ri, F, F)), "rib1": w(ks[10], (Ri, F)),
        "riw2": w(ks[11], (Ri, F, F)), "rib2": w(ks[12], (Ri, F)),
        "wd": w(ks[13], (F, F)), "bd": w(ks[14], (F,)),
        "u": jax.random.uniform(ks[15], (F,), jnp.float32),          # th.rand(F)
        "raw1": w(ks[16], (Ra, F, F)), "rab1": w(ks[17], (Ra, F)),
        "raw2": w(ks[18], (Ra, F, F)), "rab2": w(ks[19], (Ra, F)),
    }

    # matmul_dtype=jnp.bfloat16 (the default) feeds the MXU at its fast rate in
    # production; the demo uses f32 so the result matches the f32 PyTorch reference.
    prep = prepare_params(params, N, P, matmul_dtype=jnp.float32)

    @jax.jit
    def run(x_, rbf_, ii_, ij_, prep_):
        return physnet_interaction_block(x_, rbf_, ii_, ij_, prep_)

    out = jax.block_until_ready(run(x, rbf, idx_i, idx_j, prep))
    ref = reference(x, rbf, idx_i, idx_j, params)

    assert out.shape == (N, F)
    err = float(jnp.max(jnp.abs(out - ref)))
    # Tolerance covers the EUP approximate-reciprocal softmax denominator and f32 MXU
    # accumulation-order differences.
    assert jnp.allclose(out, ref, rtol=5e-3, atol=5e-3), err
    print("KERNEL_OK")
</pallas_src>

<mosaic_0001>
module attributes {stable_mosaic.version = 11 : i64} {
  func.func @_interaction_kernel(%arg0: i32, %arg1: memref<16x32xf32, #tpu.memory_space<vmem>>, %arg2: memref<16x128xf32, #tpu.memory_space<vmem>>, %arg3: memref<32x32xf32, #tpu.memory_space<vmem>>, %arg4: memref<1x32xf32, #tpu.memory_space<vmem>>, %arg5: memref<32x128xf32, #tpu.memory_space<vmem>>, %arg6: memref<128x4xf32, #tpu.memory_space<vmem>>, %arg7: memref<4x128xf32, #tpu.memory_space<vmem>>, %arg8: memref<128x32xf32, #tpu.memory_space<vmem>>, %arg9: memref<2x32x32xf32, #tpu.memory_space<vmem>>, %arg10: memref<2x1x32xf32, #tpu.memory_space<vmem>>, %arg11: memref<2x32x32xf32, #tpu.memory_space<vmem>>, %arg12: memref<2x1x32xf32, #tpu.memory_space<vmem>>, %arg13: memref<32x32xf32, #tpu.memory_space<vmem>>, %arg14: memref<1x32xf32, #tpu.memory_space<vmem>>, %arg15: memref<1x32xf32, #tpu.memory_space<vmem>>, %arg16: memref<2x32x32xf32, #tpu.memory_space<vmem>>, %arg17: memref<2x1x32xf32, #tpu.memory_space<vmem>>, %arg18: memref<2x32x32xf32, #tpu.memory_space<vmem>>, %arg19: memref<2x1x32xf32, #tpu.memory_space<vmem>>, %arg20: memref<16x32xf32, #tpu.memory_space<vmem>>) attributes {dimension_semantics = [#tpu.dimension_semantics<parallel>], iteration_bounds = array<i64: 2>, scalar_prefetch = 0 : i64, scratch_operands = 0 : i64, tpu.core_type = #tpu.core_type<tc>, window_params = [{transform_indices = @transform_0, window_bounds = array<i64: 16, 32>}, {transform_indices = @transform_1, window_bounds = array<i64: 16, 128>}, {pipeline_mode = #tpu.pipeline_mode<synchronous>, transform_indices = @transform_2, window_bounds = array<i64: 32, 32>}, {pipeline_mode = #tpu.pipeline_mode<synchronous>, transform_indices = @transform_3, window_bounds = array<i64: 1, 32>}, {pipeline_mode = #tpu.pipeline_mode<synchronous>, transform_indices = @transform_4, window_bounds = array<i64: 32, 128>}, {pipeline_mode = #tpu.pipeline_mode<synchronous>, transform_indices = @transform_5, window_bounds = array<i64: 128, 4>}, {pipeline_mode = #tpu.pipeline_mode<synchronous>, transform_indices = @transform_6, window_bounds = array<i64: 4, 128>}, {pipeline_mode = #tpu.pipeline_mode<synchronous>, transform_indices = @transform_7, window_bounds = array<i64: 128, 32>}, {pipeline_mode = #tpu.pipeline_mode<synchronous>, transform_indices = @transform_8, window_bounds = array<i64: 2, 32, 32>}, {pipeline_mode = #tpu.pipeline_mode<synchronous>, transform_indices = @transform_9, window_bounds = array<i64: 2, 1, 32>}, {pipeline_mode = #tpu.pipeline_mode<synchronous>, transform_indices = @transform_10, window_bounds = array<i64: 2, 32, 32>}, {pipeline_mode = #tpu.pipeline_mode<synchronous>, transform_indices = @transform_11, window_bounds = array<i64: 2, 1, 32>}, {pipeline_mode = #tpu.pipeline_mode<synchronous>, transform_indices = @transform_12, window_bounds = array<i64: 32, 32>}, {pipeline_mode = #tpu.pipeline_mode<synchronous>, transform_indices = @transform_13, window_bounds = array<i64: 1, 32>}, {pipeline_mode = #tpu.pipeline_mode<synchronous>, transform_indices = @transform_14, window_bounds = array<i64: 1, 32>}, {pipeline_mode = #tpu.pipeline_mode<synchronous>, transform_indices = @transform_15, window_bounds = array<i64: 2, 32, 32>}, {pipeline_mode = #tpu.pipeline_mode<synchronous>, transform_indices = @transform_16, window_bounds = array<i64: 2, 1, 32>}, {pipeline_mode = #tpu.pipeline_mode<synchronous>, transform_indices = @transform_17, window_bounds = array<i64: 2, 32, 32>}, {pipeline_mode = #tpu.pipeline_mode<synchronous>, transform_indices = @transform_18, window_bounds = array<i64: 2, 1, 32>}, {transform_indices = @transform_19, window_bounds = array<i64: 16, 32>}]} {
    %c0 = arith.constant 0 : index
    %c0_0 = arith.constant 0 : index
    %0 = vector.load %arg1[%c0, %c0_0] : memref<16x32xf32, #tpu.memory_space<vmem>>, vector<16x32xf32>
    %cst = arith.constant 0.000000e+00 : f32
    %1 = vector.broadcast %cst : f32 to vector<16x32xf32>
    %2 = arith.maximumf %0, %1 : vector<16x32xf32>
    %3 = math.absf %0 : vector<16x32xf32>
    %cst_1 = arith.constant 0.000000e+00 : f32
    %4 = vector.broadcast %cst_1 : f32 to vector<16x32xf32>
    %5 = arith.subf %4, %3 : vector<16x32xf32>
    %6 = math.exp %5 : vector<16x32xf32>
    %cst_2 = arith.constant 1.000000e+00 : f32
    %7 = vector.broadcast %cst_2 : f32 to vector<16x32xf32>
    %8 = arith.addf %7, %6 : vector<16x32xf32>
    %9 = math.log %8 : vector<16x32xf32>
    %10 = arith.addf %2, %9 : vector<16x32xf32>
    %cst_3 = arith.constant 0.693147182 : f32
    %11 = vector.broadcast %cst_3 : f32 to vector<16x32xf32>
    %12 = arith.subf %10, %11 : vector<16x32xf32>
    %c0_4 = arith.constant 0 : index
    %c0_5 = arith.constant 0 : index
    %13 = vector.load %arg3[%c0_4, %c0_5] : memref<32x32xf32, #tpu.memory_space<vmem>>, vector<32x32xf32>
    %cst_6 = arith.constant dense<0.000000e+00> : vector<16x32xf32>
    %14 = tpu.matmul %12, %13, %cst_6 {dimension_numbers = #tpu.dot_dimension_numbers<[1], [0], [0], [1], [0, 0, 1, 1], [], []>} : vector<16x32xf32>, vector<32x32xf32>, vector<16x32xf32> -> vector<16x32xf32>
    %c0_7 = arith.constant 0 : index
    %c0_8 = arith.constant 0 : index
    %15 = vector.load %arg4[%c0_7, %c0_8] : memref<1x32xf32, #tpu.memory_space<vmem>>, vector<1x32xf32>
    %16 = vector.broadcast %15 : vector<1x32xf32> to vector<16x32xf32>
    %17 = arith.addf %14, %16 : vector<16x32xf32>
    %c0_9 = arith.constant 0 : index
    %c0_10 = arith.constant 0 : index
    %18 = vector.load %arg2[%c0_9, %c0_10] : memref<16x128xf32, #tpu.memory_space<vmem>>, vector<16x128xf32>
    %c0_11 = arith.constant 0 : index
    %c0_12 = arith.constant 0 : index
    %19 = vector.load %arg5[%c0_11, %c0_12] : memref<32x128xf32, #tpu.memory_space<vmem>>, vector<32x128xf32>
    %cst_13 = arith.constant dense<0.000000e+00> : vector<16x128xf32>
    %20 = tpu.matmul %17, %19, %cst_13 {dimension_numbers = #tpu.dot_dimension_numbers<[1], [0], [0], [1], [0, 0, 1, 1], [], []>} : vector<16x32xf32>, vector<32x128xf32>, vector<16x128xf32> -> vector<16x128xf32>
    %21 = arith.mulf %20, %18 : vector<16x128xf32>
    %c0_14 = arith.constant 0 : index
    %c0_15 = arith.constant 0 : index
    %22 = vector.load %arg6[%c0_14, %c0_15] : memref<128x4xf32, #tpu.memory_space<vmem>>, vector<128x4xf32>
    %cst_16 = arith.constant dense<0.000000e+00> : vector<16x4xf32>
    %23 = tpu.matmul %21, %22, %cst_16 {dimension_numbers = #tpu.dot_dimension_numbers<[1], [0], [0], [1], [0, 0, 1, 1], [], []>} : vector<16x128xf32>, vector<128x4xf32>, vector<16x4xf32> -> vector<16x4xf32>
    %cst_17 = arith.constant dense<0xFF800000> : vector<16xf32>
    %24 = vector.multi_reduction <maximumf>, %23, %cst_17 [1] : vector<16x4xf32> to vector<16xf32>
    %25 = vector.shape_cast %24 : vector<16xf32> to vector<16x1xf32>
    %26 = vector.broadcast %25 : vector<16x1xf32> to vector<16x4xf32>
    %27 = arith.subf %23, %26 : vector<16x4xf32>
    %28 = math.exp %27 : vector<16x4xf32>
    %cst_18 = arith.constant dense<0.000000e+00> : vector<16xf32>
    %29 = vector.multi_reduction <add>, %28, %cst_18 [1] : vector<16x4xf32> to vector<16xf32>
    %30 = vector.shape_cast %29 : vector<16xf32> to vector<16x1xf32>
    %31 = tpu.reciprocal %30 {approx = true} : vector<16x1xf32> -> vector<16x1xf32>
    %32 = vector.broadcast %31 : vector<16x1xf32> to vector<16x4xf32>
    %33 = arith.mulf %28, %32 : vector<16x4xf32>
    %c0_19 = arith.constant 0 : index
    %c0_20 = arith.constant 0 : index
    %34 = vector.load %arg7[%c0_19, %c0_20] : memref<4x128xf32, #tpu.memory_space<vmem>>, vector<4x128xf32>
    %cst_21 = arith.constant dense<0.000000e+00> : vector<16x128xf32>
    %35 = tpu.matmul %33, %34, %cst_21 {dimension_numbers = #tpu.dot_dimension_numbers<[1], [0], [0], [1], [0, 0, 1, 1], [], []>} : vector<16x4xf32>, vector<4x128xf32>, vector<16x128xf32> -> vector<16x128xf32>
    %36 = arith.mulf %35, %18 : vector<16x128xf32>
    %c0_22 = arith.constant 0 : index
    %c0_23 = arith.constant 0 : index
    %37 = vector.load %arg8[%c0_22, %c0_23] : memref<128x32xf32, #tpu.memory_space<vmem>>, vector<128x32xf32>
    %cst_24 = arith.constant dense<0.000000e+00> : vector<16x32xf32>
    %38 = tpu.matmul %36, %37, %cst_24 {dimension_numbers = #tpu.dot_dimension_numbers<[1], [0], [0], [1], [0, 0, 1, 1], [], []>} : vector<16x128xf32>, vector<128x32xf32>, vector<16x32xf32> -> vector<16x32xf32>
    %39 = arith.addf %17, %38 : vector<16x32xf32>
    %cst_25 = arith.constant 0.000000e+00 : f32
    %40 = vector.broadcast %cst_25 : f32 to vector<16x32xf32>
    %41 = arith.maximumf %39, %40 : vector<16x32xf32>
    %42 = math.absf %39 : vector<16x32xf32>
    %cst_26 = arith.constant 0.000000e+00 : f32
    %43 = vector.broadcast %cst_26 : f32 to vector<16x32xf32>
    %44 = arith.subf %43, %42 : vector<16x32xf32>
    %45 = math.exp %44 : vector<16x32xf32>
    %cst_27 = arith.constant 1.000000e+00 : f32
    %46 = vector.broadcast %cst_27 : f32 to vector<16x32xf32>
    %47 = arith.addf %46, %45 : vector<16x32xf32>
    %48 = math.log %47 : vector<16x32xf32>
    %49 = arith.addf %41, %48 : vector<16x32xf32>
    %cst_28 = arith.constant 0.693147182 : f32
    %50 = vector.broadcast %cst_28 : f32 to vector<16x32xf32>
    %51 = arith.subf %49, %50 : vector<16x32xf32>
    %c0_29 = arith.constant 0 : index
    %c0_30 = arith.constant 0 : index
    %c0_31 = arith.constant 0 : index
    %52 = vector.load %arg9[%c0_29, %c0_30, %c0_31] : memref<2x32x32xf32, #tpu.memory_space<vmem>>, vector<1x32x32xf32>
    %53 = vector.shape_cast %52 : vector<1x32x32xf32> to vector<32x32xf32>
    %cst_32 = arith.constant dense<0.000000e+00> : vector<16x32xf32>
    %54 = tpu.matmul %51, %53, %cst_32 {dimension_numbers = #tpu.dot_dimension_numbers<[1], [0], [0], [1], [0, 0, 1, 1], [], []>} : vector<16x32xf32>, vector<32x32xf32>, vector<16x32xf32> -> vector<16x32xf32>
    %c0_33 = arith.constant 0 : index
    %c0_34 = arith.constant 0 : index
    %c0_35 = arith.constant 0 : index
    %55 = vector.load %arg10[%c0_33, %c0_34, %c0_35] : memref<2x1x32xf32, #tpu.memory_space<vmem>>, vector<1x1x32xf32>
    %56 = vector.shape_cast %55 : vector<1x1x32xf32> to vector<1x32xf32>
    %57 = vector.broadcast %56 : vector<1x32xf32> to vector<16x32xf32>
    %58 = arith.addf %54, %57 : vector<16x32xf32>
    %c0_36 = arith.constant 0 : index
    %c0_37 = arith.constant 0 : index
    %c0_38 = arith.constant 0 : index
    %59 = vector.load %arg11[%c0_36, %c0_37, %c0_38] : memref<2x32x32xf32, #tpu.memory_space<vmem>>, vector<1x32x32xf32>
    %60 = vector.shape_cast %59 : vector<1x32x32xf32> to vector<32x32xf32>
    %cst_39 = arith.constant dense<0.000000e+00> : vector<16x32xf32>
    %61 = tpu.matmul %58, %60, %cst_39 {dimension_numbers = #tpu.dot_dimension_numbers<[1], [0], [0], [1], [0, 0, 1, 1], [], []>} : vector<16x32xf32>, vector<32x32xf32>, vector<16x32xf32> -> vector<16x32xf32>
    %c0_40 = arith.constant 0 : index
    %c0_41 = arith.constant 0 : index
    %c0_42 = arith.constant 0 : index
    %62 = vector.load %arg12[%c0_40, %c0_41, %c0_42] : memref<2x1x32xf32, #tpu.memory_space<vmem>>, vector<1x1x32xf32>
    %63 = vector.shape_cast %62 : vector<1x1x32xf32> to vector<1x32xf32>
    %64 = vector.broadcast %63 : vector<1x32xf32> to vector<16x32xf32>
    %65 = arith.addf %61, %64 : vector<16x32xf32>
    %66 = arith.addf %39, %65 : vector<16x32xf32>
    %cst_43 = arith.constant 0.000000e+00 : f32
    %67 = vector.broadcast %cst_43 : f32 to vector<16x32xf32>
    %68 = arith.maximumf %66, %67 : vector<16x32xf32>
    %69 = math.absf %66 : vector<16x32xf32>
    %cst_44 = arith.constant 0.000000e+00 : f32
    %70 = vector.broadcast %cst_44 : f32 to vector<16x32xf32>
    %71 = arith.subf %70, %69 : vector<16x32xf32>
    %72 = math.exp %71 : vector<16x32xf32>
    %cst_45 = arith.constant 1.000000e+00 : f32
    %73 = vector.broadcast %cst_45 : f32 to vector<16x32xf32>
    %74 = arith.addf %73, %72 : vector<16x32xf32>
    %75 = math.log %74 : vector<16x32xf32>
    %76 = arith.addf %68, %75 : vector<16x32xf32>
    %cst_46 = arith.constant 0.693147182 : f32
    %77 = vector.broadcast %cst_46 : f32 to vector<16x32xf32>
    %78 = arith.subf %76, %77 : vector<16x32xf32>
    %c1 = arith.constant 1 : index
    %c0_47 = arith.constant 0 : index
    %c0_48 = arith.constant 0 : index
    %79 = vector.load %arg9[%c1, %c0_47, %c0_48] : memref<2x32x32xf32, #tpu.memory_space<vmem>>, vector<1x32x32xf32>
    %80 = vector.shape_cast %79 : vector<1x32x32xf32> to vector<32x32xf32>
    %cst_49 = arith.constant dense<0.000000e+00> : vector<16x32xf32>
    %81 = tpu.matmul %78, %80, %cst_49 {dimension_numbers = #tpu.dot_dimension_numbers<[1], [0], [0], [1], [0, 0, 1, 1], [], []>} : vector<16x32xf32>, vector<32x32xf32>, vector<16x32xf32> -> vector<16x32xf32>
    %c1_50 = arith.constant 1 : index
    %c0_51 = arith.constant 0 : index
    %c0_52 = arith.constant 0 : index
    %82 = vector.load %arg10[%c1_50, %c0_51, %c0_52] : memref<2x1x32xf32, #tpu.memory_space<vmem>>, vector<1x1x32xf32>
    %83 = vector.shape_cast %82 : vector<1x1x32xf32> to vector<1x32xf32>
    %84 = vector.broadcast %83 : vector<1x32xf32> to vector<16x32xf32>
    %85 = arith.addf %81, %84 : vector<16x32xf32>
    %c1_53 = arith.constant 1 : index
    %c0_54 = arith.constant 0 : index
    %c0_55 = arith.constant 0 : index
    %86 = vector.load %arg11[%c1_53, %c0_54, %c0_55] : memref<2x32x32xf32, #tpu.memory_space<vmem>>, vector<1x32x32xf32>
    %87 = vector.shape_cast %86 : vector<1x32x32xf32> to vector<32x32xf32>
    %cst_56 = arith.constant dense<0.000000e+00> : vector<16x32xf32>
    %88 = tpu.matmul %85, %87, %cst_56 {dimension_numbers = #tpu.dot_dimension_numbers<[1], [0], [0], [1], [0, 0, 1, 1], [], []>} : vector<16x32xf32>, vector<32x32xf32>, vector<16x32xf32> -> vector<16x32xf32>
    %c1_57 = arith.constant 1 : index
    %c0_58 = arith.constant 0 : index
    %c0_59 = arith.constant 0 : index
    %89 = vector.load %arg12[%c1_57, %c0_58, %c0_59] : memref<2x1x32xf32, #tpu.memory_space<vmem>>, vector<1x1x32xf32>
    %90 = vector.shape_cast %89 : vector<1x1x32xf32> to vector<1x32xf32>
    %91 = vector.broadcast %90 : vector<1x32xf32> to vector<16x32xf32>
    %92 = arith.addf %88, %91 : vector<16x32xf32>
    %93 = arith.addf %66, %92 : vector<16x32xf32>
    %cst_60 = arith.constant 0.000000e+00 : f32
    %94 = vector.broadcast %cst_60 : f32 to vector<16x32xf32>
    %95 = arith.maximumf %93, %94 : vector<16x32xf32>
    %96 = math.absf %93 : vector<16x32xf32>
    %cst_61 = arith.constant 0.000000e+00 : f32
    %97 = vector.broadcast %cst_61 : f32 to vector<16x32xf32>
    %98 = arith.subf %97, %96 : vector<16x32xf32>
    %99 = math.exp %98 : vector<16x32xf32>
    %cst_62 = arith.constant 1.000000e+00 : f32
    %100 = vector.broadcast %cst_62 : f32 to vector<16x32xf32>
    %101 = arith.addf %100, %99 : vector<16x32xf32>
    %102 = math.log %101 : vector<16x32xf32>
    %103 = arith.addf %95, %102 : vector<16x32xf32>
    %cst_63 = arith.constant 0.693147182 : f32
    %104 = vector.broadcast %cst_63 : f32 to vector<16x32xf32>
    %105 = arith.subf %103, %104 : vector<16x32xf32>
    %c0_64 = arith.constant 0 : index
    %c0_65 = arith.constant 0 : index
    %106 = vector.load %arg15[%c0_64, %c0_65] : memref<1x32xf32, #tpu.memory_space<vmem>>, vector<1x32xf32>
    %107 = vector.broadcast %106 : vector<1x32xf32> to vector<16x32xf32>
    %108 = arith.mulf %107, %0 : vector<16x32xf32>
    %c0_66 = arith.constant 0 : index
    %c0_67 = arith.constant 0 : index
    %109 = vector.load %arg13[%c0_66, %c0_67] : memref<32x32xf32, #tpu.memory_space<vmem>>, vector<32x32xf32>
    %cst_68 = arith.constant dense<0.000000e+00> : vector<16x32xf32>
    %110 = tpu.matmul %105, %109, %cst_68 {dimension_numbers = #tpu.dot_dimension_numbers<[1], [0], [0], [1], [0, 0, 1, 1], [], []>} : vector<16x32xf32>, vector<32x32xf32>, vector<16x32xf32> -> vector<16x32xf32>
    %111 = arith.addf %108, %110 : vector<16x32xf32>
    %c0_69 = arith.constant 0 : index
    %c0_70 = arith.constant 0 : index
    %112 = vector.load %arg14[%c0_69, %c0_70] : memref<1x32xf32, #tpu.memory_space<vmem>>, vector<1x32xf32>
    %113 = vector.broadcast %112 : vector<1x32xf32> to vector<16x32xf32>
    %114 = arith.addf %111, %113 : vector<16x32xf32>
    %cst_71 = arith.constant 0.000000e+00 : f32
    %115 = vector.broadcast %cst_71 : f32 to vector<16x32xf32>
    %116 = arith.maximumf %114, %115 : vector<16x32xf32>
    %117 = math.absf %114 : vector<16x32xf32>
    %cst_72 = arith.constant 0.000000e+00 : f32
    %118 = vector.broadcast %cst_72 : f32 to vector<16x32xf32>
    %119 = arith.subf %118, %117 : vector<16x32xf32>
    %120 = math.exp %119 : vector<16x32xf32>
    %cst_73 = arith.constant 1.000000e+00 : f32
    %121 = vector.broadcast %cst_73 : f32 to vector<16x32xf32>
    %122 = arith.addf %121, %120 : vector<16x32xf32>
    %123 = math.log %122 : vector<16x32xf32>
    %124 = arith.addf %116, %123 : vector<16x32xf32>
    %cst_74 = arith.constant 0.693147182 : f32
    %125 = vector.broadcast %cst_74 : f32 to vector<16x32xf32>
    %126 = arith.subf %124, %125 : vector<16x32xf32>
    %c0_75 = arith.constant 0 : index
    %c0_76 = arith.constant 0 : index
    %c0_77 = arith.constant 0 : index
    %127 = vector.load %arg16[%c0_75, %c0_76, %c0_77] : memref<2x32x32xf32, #tpu.memory_space<vmem>>, vector<1x32x32xf32>
    %128 = vector.shape_cast %127 : vector<1x32x32xf32> to vector<32x32xf32>
    %cst_78 = arith.constant dense<0.000000e+00> : vector<16x32xf32>
    %129 = tpu.matmul %126, %128, %cst_78 {dimension_numbers = #tpu.dot_dimension_numbers<[1], [0], [0], [1], [0, 0, 1, 1], [], []>} : vector<16x32xf32>, vector<32x32xf32>, vector<16x32xf32> -> vector<16x32xf32>
    %c0_79 = arith.constant 0 : index
    %c0_80 = arith.constant 0 : index
    %c0_81 = arith.constant 0 : index
    %130 = vector.load %arg17[%c0_79, %c0_80, %c0_81] : memref<2x1x32xf32, #tpu.memory_space<vmem>>, vector<1x1x32xf32>
    %131 = vector.shape_cast %130 : vector<1x1x32xf32> to vector<1x32xf32>
    %132 = vector.broadcast %131 : vector<1x32xf32> to vector<16x32xf32>
    %133 = arith.addf %129, %132 : vector<16x32xf32>
    %c0_82 = arith.constant 0 : index
    %c0_83 = arith.constant 0 : index
    %c0_84 = arith.constant 0 : index
    %134 = vector.load %arg18[%c0_82, %c0_83, %c0_84] : memref<2x32x32xf32, #tpu.memory_space<vmem>>, vector<1x32x32xf32>
    %135 = vector.shape_cast %134 : vector<1x32x32xf32> to vector<32x32xf32>
    %cst_85 = arith.constant dense<0.000000e+00> : vector<16x32xf32>
    %136 = tpu.matmul %133, %135, %cst_85 {dimension_numbers = #tpu.dot_dimension_numbers<[1], [0], [0], [1], [0, 0, 1, 1], [], []>} : vector<16x32xf32>, vector<32x32xf32>, vector<16x32xf32> -> vector<16x32xf32>
    %c0_86 = arith.constant 0 : index
    %c0_87 = arith.constant 0 : index
    %c0_88 = arith.constant 0 : index
    %137 = vector.load %arg19[%c0_86, %c0_87, %c0_88] : memref<2x1x32xf32, #tpu.memory_space<vmem>>, vector<1x1x32xf32>
    %138 = vector.shape_cast %137 : vector<1x1x32xf32> to vector<1x32xf32>
    %139 = vector.broadcast %138 : vector<1x32xf32> to vector<16x32xf32>
    %140 = arith.addf %136, %139 : vector<16x32xf32>
    %141 = arith.addf %114, %140 : vector<16x32xf32>
    %cst_89 = arith.constant 0.000000e+00 : f32
    %142 = vector.broadcast %cst_89 : f32 to vector<16x32xf32>
    %143 = arith.maximumf %141, %142 : vector<16x32xf32>
    %144 = math.absf %141 : vector<16x32xf32>
    %cst_90 = arith.constant 0.000000e+00 : f32
    %145 = vector.broadcast %cst_90 : f32 to vector<16x32xf32>
    %146 = arith.subf %145, %144 : vector<16x32xf32>
    %147 = math.exp %146 : vector<16x32xf32>
    %cst_91 = arith.constant 1.000000e+00 : f32
    %148 = vector.broadcast %cst_91 : f32 to vector<16x32xf32>
    %149 = arith.addf %148, %147 : vector<16x32xf32>
    %150 = math.log %149 : vector<16x32xf32>
    %151 = arith.addf %143, %150 : vector<16x32xf32>
    %cst_92 = arith.constant 0.693147182 : f32
    %152 = vector.broadcast %cst_92 : f32 to vector<16x32xf32>
    %153 = arith.subf %151, %152 : vector<16x32xf32>
    %c1_93 = arith.constant 1 : index
    %c0_94 = arith.constant 0 : index
    %c0_95 = arith.constant 0 : index
    %154 = vector.load %arg16[%c1_93, %c0_94, %c0_95] : memref<2x32x32xf32, #tpu.memory_space<vmem>>, vector<1x32x32xf32>
    %155 = vector.shape_cast %154 : vector<1x32x32xf32> to vector<32x32xf32>
    %cst_96 = arith.constant dense<0.000000e+00> : vector<16x32xf32>
    %156 = tpu.matmul %153, %155, %cst_96 {dimension_numbers = #tpu.dot_dimension_numbers<[1], [0], [0], [1], [0, 0, 1, 1], [], []>} : vector<16x32xf32>, vector<32x32xf32>, vector<16x32xf32> -> vector<16x32xf32>
    %c1_97 = arith.constant 1 : index
    %c0_98 = arith.constant 0 : index
    %c0_99 = arith.constant 0 : index
    %157 = vector.load %arg17[%c1_97, %c0_98, %c0_99] : memref<2x1x32xf32, #tpu.memory_space<vmem>>, vector<1x1x32xf32>
    %158 = vector.shape_cast %157 : vector<1x1x32xf32> to vector<1x32xf32>
    %159 = vector.broadcast %158 : vector<1x32xf32> to vector<16x32xf32>
    %160 = arith.addf %156, %159 : vector<16x32xf32>
    %c1_100 = arith.constant 1 : index
    %c0_101 = arith.constant 0 : index
    %c0_102 = arith.constant 0 : index
    %161 = vector.load %arg18[%c1_100, %c0_101, %c0_102] : memref<2x32x32xf32, #tpu.memory_space<vmem>>, vector<1x32x32xf32>
    %162 = vector.shape_cast %161 : vector<1x32x32xf32> to vector<32x32xf32>
    %cst_103 = arith.constant dense<0.000000e+00> : vector<16x32xf32>
    %163 = tpu.matmul %160, %162, %cst_103 {dimension_numbers = #tpu.dot_dimension_numbers<[1], [0], [0], [1], [0, 0, 1, 1], [], []>} : vector<16x32xf32>, vector<32x32xf32>, vector<16x32xf32> -> vector<16x32xf32>
    %c1_104 = arith.constant 1 : index
    %c0_105 = arith.constant 0 : index
    %c0_106 = arith.constant 0 : index
    %164 = vector.load %arg19[%c1_104, %c0_105, %c0_106] : memref<2x1x32xf32, #tpu.memory_space<vmem>>, vector<1x1x32xf32>
    %165 = vector.shape_cast %164 : vector<1x1x32xf32> to vector<1x32xf32>
    %166 = vector.broadcast %165 : vector<1x32xf32> to vector<16x32xf32>
    %167 = arith.addf %163, %166 : vector<16x32xf32>
    %168 = arith.addf %141, %167 : vector<16x32xf32>
    %c0_107 = arith.constant 0 : index
    %c0_108 = arith.constant 0 : index
    %169 = vector.load %arg20[%c0_107, %c0_108] : memref<16x32xf32, #tpu.memory_space<vmem>>, vector<16x32xf32>
    tpu.vector_store %arg20[%c0_107, %c0_108], %168 {strides = array<i32>} : memref<16x32xf32, #tpu.memory_space<vmem>>, vector<16x32xf32>,
    return
  }
  func.func @transform_0(%arg0: i32) -> (i32, i32) {
    %c0_i32 = arith.constant 0 : i32
    %c0_i32_0 = arith.constant 0 : i32
    return %arg0, %c0_i32 : i32, i32
  }
  func.func @transform_1(%arg0: i32) -> (i32, i32) {
    %c0_i32 = arith.constant 0 : i32
    %c0_i32_0 = arith.constant 0 : i32
    return %arg0, %c0_i32 : i32, i32
  }
  func.func @transform_2(%arg0: i32) -> (i32, i32) {
    %c0_i32 = arith.constant 0 : i32
    %c0_i32_0 = arith.constant 0 : i32
    %c0_i32_1 = arith.constant 0 : i32
    return %c0_i32, %c0_i32_0 : i32, i32
  }
  func.func @transform_3(%arg0: i32) -> (i32, i32) {
    %c0_i32 = arith.constant 0 : i32
    %c0_i32_0 = arith.constant 0 : i32
    %c0_i32_1 = arith.constant 0 : i32
    return %c0_i32, %c0_i32_0 : i32, i32
  }
  func.func @transform_4(%arg0: i32) -> (i32, i32) {
    %c0_i32 = arith.constant 0 : i32
    %c0_i32_0 = arith.constant 0 : i32
    %c0_i32_1 = arith.constant 0 : i32
    return %c0_i32, %c0_i32_0 : i32, i32
  }
  func.func @transform_5(%arg0: i32) -> (i32, i32) {
    %c0_i32 = arith.constant 0 : i32
    %c0_i32_0 = arith.constant 0 : i32
    %c0_i32_1 = arith.constant 0 : i32
    return %c0_i32, %c0_i32_0 : i32, i32
  }
  func.func @transform_6(%arg0: i32) -> (i32, i32) {
    %c0_i32 = arith.constant 0 : i32
    %c0_i32_0 = arith.constant 0 : i32
    %c0_i32_1 = arith.constant 0 : i32
    return %c0_i32, %c0_i32_0 : i32, i32
  }
  func.func @transform_7(%arg0: i32) -> (i32, i32) {
    %c0_i32 = arith.constant 0 : i32
    %c0_i32_0 = arith.constant 0 : i32
    %c0_i32_1 = arith.constant 0 : i32
    return %c0_i32, %c0_i32_0 : i32, i32
  }
  func.func @transform_8(%arg0: i32) -> (i32, i32, i32) {
    %c0_i32 = arith.constant 0 : i32
    %c0_i32_0 = arith.constant 0 : i32
    %c0_i32_1 = arith.constant 0 : i32
    %c0_i32_2 = arith.constant 0 : i32
    return %c0_i32, %c0_i32_0, %c0_i32_1 : i32, i32, i32
  }
  func.func @transform_9(%arg0: i32) -> (i32, i32, i32) {
    %c0_i32 = arith.constant 0 : i32
    %c0_i32_0 = arith.constant 0 : i32
    %c0_i32_1 = arith.constant 0 : i32
    %c0_i32_2 = arith.constant 0 : i32
    return %c0_i32, %c0_i32_0, %c0_i32_1 : i32, i32, i32
  }
  func.func @transform_10(%arg0: i32) -> (i32, i32, i32) {
    %c0_i32 = arith.constant 0 : i32
    %c0_i32_0 = arith.constant 0 : i32
    %c0_i32_1 = arith.constant 0 : i32
    %c0_i32_2 = arith.constant 0 : i32
    return %c0_i32, %c0_i32_0, %c0_i32_1 : i32, i32, i32
  }
  func.func @transform_11(%arg0: i32) -> (i32, i32, i32) {
    %c0_i32 = arith.constant 0 : i32
    %c0_i32_0 = arith.constant 0 : i32
    %c0_i32_1 = arith.constant 0 : i32
    %c0_i32_2 = arith.constant 0 : i32
    return %c0_i32, %c0_i32_0, %c0_i32_1 : i32, i32, i32
  }
  func.func @transform_12(%arg0: i32) -> (i32, i32) {
    %c0_i32 = arith.constant 0 : i32
    %c0_i32_0 = arith.constant 0 : i32
    %c0_i32_1 = arith.constant 0 : i32
    return %c0_i32, %c0_i32_0 : i32, i32
  }
  func.func @transform_13(%arg0: i32) -> (i32, i32) {
    %c0_i32 = arith.constant 0 : i32
    %c0_i32_0 = arith.constant 0 : i32
    %c0_i32_1 = arith.constant 0 : i32
    return %c0_i32, %c0_i32_0 : i32, i32
  }
  func.func @transform_14(%arg0: i32) -> (i32, i32) {
    %c0_i32 = arith.constant 0 : i32
    %c0_i32_0 = arith.constant 0 : i32
    %c0_i32_1 = arith.constant 0 : i32
    return %c0_i32, %c0_i32_0 : i32, i32
  }
  func.func @transform_15(%arg0: i32) -> (i32, i32, i32) {
    %c0_i32 = arith.constant 0 : i32
    %c0_i32_0 = arith.constant 0 : i32
    %c0_i32_1 = arith.constant 0 : i32
    %c0_i32_2 = arith.constant 0 : i32
    return %c0_i32, %c0_i32_0, %c0_i32_1 : i32, i32, i32
  }
  func.func @transform_16(%arg0: i32) -> (i32, i32, i32) {
    %c0_i32 = arith.constant 0 : i32
    %c0_i32_0 = arith.constant 0 : i32
    %c0_i32_1 = arith.constant 0 : i32
    %c0_i32_2 = arith.constant 0 : i32
    return %c0_i32, %c0_i32_0, %c0_i32_1 : i32, i32, i32
  }
  func.func @transform_17(%arg0: i32) -> (i32, i32, i32) {
    %c0_i32 = arith.constant 0 : i32
    %c0_i32_0 = arith.constant 0 : i32
    %c0_i32_1 = arith.constant 0 : i32
    %c0_i32_2 = arith.constant 0 : i32
    return %c0_i32, %c0_i32_0, %c0_i32_1 : i32, i32, i32
  }
  func.func @transform_18(%arg0: i32) -> (i32, i32, i32) {
    %c0_i32 = arith.constant 0 : i32
    %c0_i32_0 = arith.constant 0 : i32
    %c0_i32_1 = arith.constant 0 : i32
    %c0_i32_2 = arith.constant 0 : i32
    return %c0_i32, %c0_i32_0, %c0_i32_1 : i32, i32, i32
  }
  func.func @transform_19(%arg0: i32) -> (i32, i32) {
    %c0_i32 = arith.constant 0 : i32
    %c0_i32_0 = arith.constant 0 : i32
    return %arg0, %c0_i32 : i32, i32
  }
}

</mosaic_0001>

<bundles_post_ra>
// kernel: run.1
= control target key start
LH: loop header
LB: loop body
LE: loop exit
PB: predicated region body
PF: predicated region fallthrough
CT: control target
= control target key end

     0   :  { %s2177_s0 = inlined_call_operand.vmem [shape: f32[32,32], index: 0, kind: input, shape index: {}]   ;;  %s2178_s1 = inlined_call_operand.vmem [shape: f32[32,128], index: 1, kind: input, shape index: {}]   ;;  %s2179_s2 = inlined_call_operand.vmem [shape: f32[32,32], index: 2, kind: input, shape index: {}]   ;;  %s2180_s3 = inlined_call_operand.vmem [shape: f32[1,32], index: 3, kind: input, shape index: {}]   ;;  %s2181_s4 = inlined_call_operand.vmem [shape: f32[32,128], index: 4, kind: input, shape index: {}]   ;;  %s2182_s5 = inlined_call_operand.vmem [shape: f32[128,4], index: 5, kind: input, shape index: {}]   ;;  %s2183_s6 = inlined_call_operand.vmem [shape: f32[4,128], index: 6, kind: input, shape index: {}]   ;;  %s2184_s7 = inlined_call_operand.vmem [shape: f32[128,32], index: 7, kind: input, shape index: {}]   ;;  %s2185_s8 = inlined_call_operand.vmem [shape: f32[2,32,32], index: 8, kind: input, shape index: {}]   ;;  %s2186_s9 = inlined_call_operand.vmem [shape: f32[2,1,32], index: 9, kind: input, shape index: {}]   ;;  %s2187_s10 = inlined_call_operand.vmem [shape: f32[2,32,32], index: 10, kind: input, shape index: {}]   ;;  %s2188_s11 = inlined_call_operand.vmem [shape: f32[2,1,32], index: 11, kind: input, shape index: {}]   ;;  %s2189_s12 = inlined_call_operand.vmem [shape: f32[32,32], index: 12, kind: input, shape index: {}]   ;;  %s2190_s13 = inlined_call_operand.vmem [shape: f32[1,32], index: 13, kind: input, shape index: {}]   ;;  %s2191_s14 = inlined_call_operand.vmem [shape: f32[1,32], index: 14, kind: input, shape index: {}]   ;;  %s2192_s15 = inlined_call_operand.vmem [shape: f32[2,32,32], index: 15, kind: input, shape index: {}]   ;;  %s2193_s16 = inlined_call_operand.vmem [shape: f32[2,1,32], index: 16, kind: input, shape index: {}]   ;;  %s2194_s17 = inlined_call_operand.vmem [shape: f32[2,32,32], index: 17, kind: input, shape index: {}]   ;;  %s2195_s18 = inlined_call_operand.vmem [shape: f32[2,1,32], index: 18, kind: input, shape index: {}]   ;;  %s2196_s19 = inlined_call_operand.hbm [shape: f32[32,32], index: 19, kind: output, shape index: {}]  }
   0x1   :  { %2205 = sst [smem:[#allocation10_spill]] %s2177_s0 }
   0x2   :  { %2206 = sst [smem:[#allocation11_spill]] %s2178_s1 }
   0x3   :  { %2207 = sst [smem:[#allocation12_spill]] %s2179_s2 }
   0x4   :  { %2208 = sst [smem:[#allocation13_spill]] %s2180_s3 }
   0x5   :  { %2209 = sst [smem:[#allocation14_spill]] %s2181_s4 }
   0x6   :  { %2210 = sst [smem:[#allocation15_spill]] %s2182_s5 }
   0x7   :  { %24 = vsyncpa [#allocation3], 0 }
   0x8   :  { %26 = vsyncpa [#allocation3 + $0x1], 0  ;;  %s1763_s0 = smov 0   ;;  %s1765_s30 = smov 0  }
   0x9   :  { %s1767_s20 = smov 0   ;;  %s1769_s21 = smov 0  }
   0xa LB: > { %2211 = sst [smem:[#allocation5_spill]] %s1647_s0  ;;  %s1784_s1 = sadd.s32 4294967295, %s1659_s21   ;;  %s1659_s21 = sphi %s1769_s21, %s2227_s21   ;;  %s1655_s20 = sphi %s1767_s20, %s2229_s20   ;;  %s1651_s30 = sphi %s1765_s30, %s2231_s30   ;;  %s1647_s0 = sphi %s1763_s0, %s2230_s0  }
   0xb   : > { %2212 = sst [smem:[#allocation6_spill]] %s1655_s20  ;;  %s1413_s22 = sadd.s32 4294967294, %s1659_s21  }
   0xc   : > { %s1788_s2 = sadd.s32 1, %s1659_s21   ;;  %s448_s23 = sadd.s32 1, %s1655_s20 }
   0xd   : > { %2213 = sst [smem:[#allocation7_spill]] %s1788_s2  ;;  %s445_s24 = ssub.s32 %s1659_s21, %s1788_s2 }
   0xe   : > { %p458_p0 = scmp.ne.s32.totalorder %s1655_s20, %s1651_s30  ;;  %p446_p1 = scmp.eq.s32.totalorder %s445_s24, 0 }
   0xf   : > { %p459_p2 = scmp.eq.s32.totalorder %s1784_s1, 1  ;;  %p464_p3 = scmp.ne.s32.totalorder %s1651_s30, %s1647_s0 }
  0x10   : > { %p465_p4 = scmp.eq.s32.totalorder %s1413_s22, 1  ;;  %p1416_p7 = scmp.ge.s32.totalorder %s1659_s21, 1 }
  0x11   : > { %s1799_s25 = scalar_select %p446_p1, %s1655_s20, %s448_s23  }
  0x12   : > { %p1801_p5 = por %p459_p2, %p458_p0  ;;  %p1805_p6 = por %p465_p4, %p464_p3 }
  0x13   : > { %2214 = sst [smem:[#allocation8_spill]] %s1799_s25  ;;  %p552_p8 = scmp.lt.s32.totalorder %s1659_s21, 3 }
  0x14   : > { %s2216_s26 = scalar_select %p1805_p6, 1, 0 }
  0x15   : > { %p553_p9 = pnand %p1416_p7, %p552_p8 }
  0x16   : > { %2217 = sst [smem:[#allocation9_spill]] %s2216_s26  ;;  %s1418_s24 = sshll.u32 (!%p553_p9), %s1784_s1, 1 }
  0x17   : > { %556 = sbr.rel (%p553_p9) target bundleno = 2302 (0x8fe), region = 96  ;;  %s2218_s29 = sld [smem:[#allocation12_spill]] (!%p553_p9) }
  0x18   : > { %p614_p10 = scmp.lt.s32.totalorder (!%p553_p9), %s1418_s24, 3  ;;  %s2219_s23 = sld [smem:[#allocation10_spill]] (!%p553_p9) }
  0x19   : > { %s2220_s4 = sld [smem:[#allocation14_spill]] (!%p553_p9)  ;;  %s610_s20 = sand.u32 (!%p553_p9), 1, %s1651_s30  }
  0x1a   : > { %s2221_s5 = sld [smem:[#allocation15_spill]] (!%p553_p9) }
  0x1b   : > { %s2222_s25 = sld [smem:[#allocation13_spill]] (!%p553_p9) }
  0x1c   : > { %s2233_s24 = smov (!%p614_p10, %s1418_s24), 3  ;;  %vm656_vm0 = vcmask 261120   ;;  %vm762_vm1 = vcmask 31744   ;;  %vm792_vm2 = vcmask 1043456  }
  0x1d   : > { %v651_v0 = vld [vmem:[%s2218_s29 + $0x18] sm:$0xff]  ;;  %v650_v1 = vld [vmem:[%s2218_s29 + $0x10] sm:$0xff]  ;;  %v649_v2 = vld [vmem:[%s2218_s29 + $0x8] sm:$0xff]  ;;  %s2203_s27 = sshll.u32 %s2233_s24, 3  ;;  %s2223_s26 = sshll.u32 %s2233_s24, 3 }
  0x1e   : > { %675 = vmatpush.msra.mxu0 %v651_v0  ;;  %v648_v3 = vld [vmem:[%s2218_s29] sm:$0xff]  ;;  %s617_s0 = scalar_lea.vmem %s2219_s23, %s2203_s27  ;;  %s1484_s29 = sshll.u32 %s1784_s1, 4 }
  0x1f   : > { %v1832_v4 = vld [vmem:[%s617_s0] sm:$0xff]  ;;  %v1834_v5 = vld [vmem:[%s617_s0 + $0x8] sm:$0xff]  ;;  %v691_v12 = vld [vmem:[%s2220_s4 + $0x18] sm:$0xff]  ;;  %s2224_s0 = sld [smem:[#allocation11_spill]]  ;;  %s1324_s23 = scalar_lea.sflag [#allocation3], %s610_s20 }
  0x20   : > { %676 = vmatpush.msra.mxu0 %v650_v1  ;;  %v630_v6 = vand.u32 2147483647, %v1832_v4  ;;  %v631_v7 = vand.u32 2147483647, %v1834_v5  ;;  %v690_v13 = vld [vmem:[%s2220_s4 + $0x10] sm:$0xff]  ;;  %710 = vmatpush.msra.mxu1 %v691_v12  ;;  %v628_v18 = vmax.f32 %v1832_v4, 0.0 }
  0x21   : > { %v629_v23 = vmax.f32 %v1834_v5, 0.0  ;;  %v689_v28 = vld [vmem:[%s2220_s4 + $0x8] sm:$0xff]  ;;  %v688_v29 = vld [vmem:[%s2220_s4] sm:$0xff]  ;;  %v738_v30 = vld [vmem:[%s2221_s5 + $0x78] sm:$0xff] }
  0x22   : > { %677 = vmatpush.msra.mxu0 %v649_v2  ;;  %v632_v8 = vsub.f32 0.0, %v630_v6  ;;  %v633_v9 = vsub.f32 0.0, %v631_v7  ;;  %711 = vmatpush.msra.mxu1 %v690_v13  ;;  %v737_v31 = vld [vmem:[%s2221_s5 + $0x70] sm:$0xff]  ;;  %v736_v32 = vld [vmem:[%s2221_s5 + $0x68] sm:$0xff]  ;;  %v735_v33 = vld [vmem:[%s2221_s5 + $0x60] sm:$0xff] }
  0x23   : > { %739 = vmatpush.msra.mxu2 %v738_v30  ;;  %v734_v34 = vld [vmem:[%s2221_s5 + $0x58] sm:$0xff]  ;;  %v733_v35 = vld [vmem:[%s2221_s5 + $0x50] sm:$0xff]  ;;  %v732_v36 = vld [vmem:[%s2221_s5 + $0x48] sm:$0xff] }
  0x24   : > { %678 = vmatpush.msra.mxu0 %v648_v3  ;;  %v634_v10 = vmul.f32 1.442695, %v632_v8  ;;  %v636_v11 = vmul.f32 1.442695, %v633_v9  ;;  %712 = vmatpush.msra.mxu1 %v689_v28  ;;  %v731_v37 = vld [vmem:[%s2221_s5 + $0x40] sm:$0xff]  ;;  %v730_v38 = vld [vmem:[%s2221_s5 + $0x38] sm:$0xff] }
  0x25   : > { %740 = vmatpush.msra.mxu2 %v737_v31  ;;  %v729_v39 = vld [vmem:[%s2221_s5 + $0x30] sm:$0xff]  ;;  %v1530_v40 = vld [vmem:[%s2222_s25] ss:$0 sm:$0xff]  ;;  %v728_v41 = vld [vmem:[%s2221_s5 + $0x28] sm:$0xff]  ;;  %s623_s28 = scalar_lea.vmem %s2224_s0, %s2223_s26  ;;  %s1417_s26 = sshll.u32 %s610_s20, 4 }
  0x26   : > { %1541 = vpow2.f32 %v634_v10  ;;  %713 = vmatpush.msra.mxu1 %v688_v29  ;;  %v727_v42 = vld [vmem:[%s2221_s5 + $0x20] sm:$0xff]  ;;  %v726_v45 = vld [vmem:[%s2221_s5 + $0x18] sm:$0xff]  ;;  %v725_v46 = vld [vmem:[%s2221_s5 + $0x10] sm:$0xff]  ;;  %s612_s24 = scalar_lea.vmem [#allocation2], %s1417_s26 }
  0x27   : > { %1543 = vpow2.f32 %v636_v11  ;;  %741 = vmatpush.msra.mxu2 %v736_v32  ;;  %v724_v49 = vld [vmem:[%s2221_s5 + $0x8] sm:$0xff]  ;;  %v723_v50 = vld [vmem:[%s2221_s5] sm:$0xff]  ;;  %v836_v10 = vld [vmem:[%s2184_s7 + $0x78] sm:$0xff]  ;;  %s1336_s4 = sshll.u32 %s612_s24, 4  ;;  %s1337_s4 = int_to_ptr.vmem [resolvable:$true] %s1336_s4 }
  0x28   : > { %v1918_v51 = vld [vmem:[%s623_s28] sm:$0xff]  ;;  %v1921_v54 = vld [vmem:[%s623_s28 + $0x8] sm:$0xff]  ;;  %v835_v11 = vld [vmem:[%s2184_s7 + $0x70] sm:$0xff]  ;;  %s1335_s28 = scalar_lea.hbm %s2196_s19, %s1484_s29  ;;  %s1617_s29 = scalar_lea.hbm %s2196_s19, 32 }
  0x29   : > { %742 = vmatpush.msra.mxu2 %v735_v33  ;;  %v785_v9 = vld [vmem:[%s2183_s6] sm:$0xf]  ;;  %v834_v12 = vld [vmem:[%s2184_s7 + $0x68] sm:$0xff]  ;;  %s1338_s22 = sshll.u32 %s1335_s28, 4  ;;  %s1339_s22 = int_to_ptr.hbm [resolvable:$true] %s1338_s22 }
  0x2a   : > { %1428 = vmatpush.msk.msra.mxu3 %vm792_vm2, %v785_v9  ;;  %v833_v13 = vld [vmem:[%s2184_s7 + $0x60] sm:$0xff]  ;;  %v822_v30 = vld [vmem:[%s2184_s7 + $0x8] sm:$0xff]  ;;  %s1611_s1 = sshra.s32 %s1339_s22, 4  ;;  %s1612_s1 = int_to_ptr.hbm [resolvable:$true] %s1611_s1 }
  0x2b   : > { %743 = vmatpush.msra.mxu2 %v734_v34  ;;  %v821_v31 = vld [vmem:[%s2184_s7] sm:$0xff]  ;;  %s1613_s2 = scalar_lea.hbm %s1612_s1, 16  ;;  %p1618_p0 = scmp.lt.s32.totalorder %s1612_s1, %s2196_s19 }
  0x2c   : > { %v1542_v14 = vpop.eup %1541  ;;  %837 = vmatpush.msrb.mxu3 %v836_v10  ;;  %p1614_p11 = scmp.ne.s32.totalorder %s1612_s1, %s1613_s2  ;;  %p1619_p1 = scmp.lt.s32.totalorder %s1617_s29, %s1613_s2 }
  0x2d   : > { %v1544_v15 = vpop.eup %1543  ;;  %v638_v16 = vadd.f32 1.0, %v1542_v14  ;;  %744 = vmatpush.msra.mxu2 %v733_v35  ;;  %v832_v14 = vld [vmem:[%s2184_s7 + $0x58] sm:$0xff] }
  0x2e   : > { %v639_v17 = vadd.f32 1.0, %v1544_v15  ;;  %838 = vmatpush.msrb.mxu3 %v835_v11  ;;  %v831_v15 = vld [vmem:[%s2184_s7 + $0x50] sm:$0xff]  ;;  %v1442_v11 = vld [vmem:[%s2185_s8 + $0x38] sm:$0xff]  ;;  %p1615_p12 = pnand %p1614_p11, %p1801_p5  ;;  %p1620_p2 = por %p1619_p1, %p1618_p0 }
  0x2f   : > { %1545 = vlog2.f32 %v638_v16  ;;  %745 = vmatpush.msra.mxu2 %v732_v36  ;;  %v830_v16 = vld [vmem:[%s2184_s7 + $0x48] sm:$0xff]  ;;  %v885_v36 = vld [vmem:[%s2185_s8 + $0x18] sm:$0xff] }
  0x30   : > { %1547 = vlog2.f32 %v639_v17  ;;  %839 = vmatpush.msrb.mxu3 %v834_v12  ;;  %v829_v17 = vld [vmem:[%s2184_s7 + $0x40] sm:$0xff]  ;;  %908 = vmatpush.msrb.mxu0 %v885_v36  ;;  %v1441_v12 = vld [vmem:[%s2185_s8 + $0x30] sm:$0xff]  ;;  %p1616_p13 = pneg %p1615_p12 }
  0x31   : > { %746 = vmatpush.msra.mxu2 %v731_v37  ;;  %v884_v37 = vld [vmem:[%s2185_s8 + $0x10] sm:$0xff] }
  0x32   : > { %840 = vmatpush.msrb.mxu3 %v833_v13  ;;  %909 = vmatpush.msrb.mxu0 %v884_v37  ;;  %v1532_v13 = vld [vmem:[%s2188_s11] ss:$0 sm:$0xff]  ;;  %p1621_p3 = pnand %p1620_p2, %p1616_p13 }
  0x33   : > { %747 = vmatpush.msra.mxu2 %v730_v38  ;;  %v883_v38 = vld [vmem:[%s2185_s8 + $0x8] sm:$0xff] }
  0x34   : > { %841 = vmatpush.msrb.mxu3 %v832_v14  ;;  %910 = vmatpush.msrb.mxu0 %v883_v38  ;;  %v1440_v14 = vld [vmem:[%s2185_s8 + $0x28] sm:$0xff] }
  0x35   : > { %v1546_v19 = vpop.eup %1545  ;;  %748 = vmatpush.msra.mxu2 %v729_v39  ;;  %v882_v39 = vld [vmem:[%s2185_s8] sm:$0xff] }
  0x36   : > { %v1548_v20 = vpop.eup %1547  ;;  %v641_v21 = vmul.f32 0.6931472, %v1546_v19  ;;  %842 = vmatpush.msrb.mxu3 %v831_v15  ;;  %v828_v19 = vld [vmem:[%s2184_s7 + $0x38] sm:$0xff]  ;;  %911 = vmatpush.msrb.mxu0 %v882_v39  ;;  %v1439_v15 = vld [vmem:[%s2185_s8 + $0x20] sm:$0xff] }
  0x37   : > { %v643_v24 = vmul.f32 0.6931472, %v1548_v20  ;;  %749 = vmatpush.msra.mxu2 %v728_v41  ;;  %v827_v20 = vld [vmem:[%s2184_s7 + $0x30] sm:$0xff] }
  0x38   : > { %v644_v22 = vadd.f32 %v641_v21, %v628_v18  ;;  %843 = vmatpush.msrb.mxu3 %v830_v16  ;;  %v826_v21 = vld [vmem:[%s2184_s7 + $0x28] sm:$0xff] }
  0x39   : > { %v645_v26 = vadd.f32 %v643_v24, %v629_v23  ;;  %750 = vmatpush.msra.mxu2 %v727_v42 }
  0x3a   : > { %v1422_v25 = vadd.f32 -0.6931472, %v644_v22  ;;  %844 = vmatpush.msrb.mxu3 %v829_v17  ;;  %v825_v22 = vld [vmem:[%s2184_s7 + $0x20] sm:$0xff] }
  0x3b   : > { %v1423_v27 = vadd.f32 -0.6931472, %v645_v26  ;;  %751 = vmatpush.msra.mxu2 %v726_v45  ;;  %v824_v26 = vld [vmem:[%s2184_s7 + $0x18] sm:$0xff] }
  0x3c   : > { %1424 = vmatmul.msk.f32.vlgmr.msra.gmra.mxu0 %vm656_vm0, %v1422_v25  ;;  %845 = vmatpush.msrb.mxu3 %v828_v19 }
  0x3d   : > { %752 = vmatpush.msra.mxu2 %v725_v46  ;;  %v922_v46 = vld [vmem:[%s2187_s10 + $0x18] sm:$0xff]  ;;  %1006 = vmatpush.msra.mxu0 %v1442_v11 }
  0x3e   : > { %846 = vmatpush.msrb.mxu3 %v827_v20  ;;  %945 = vmatpush.msrb.mxu1 %v922_v46 }
  0x3f   : > { %753 = vmatpush.msra.mxu2 %v724_v49  ;;  %1007 = vmatpush.msra.mxu0 %v1441_v12 }
  0x40   : > { %847 = vmatpush.msrb.mxu3 %v826_v21 }
  0x41   : > { %754 = vmatpush.msra.mxu2 %v723_v50  ;;  %1008 = vmatpush.msra.mxu0 %v1440_v14 }
  0x42   : > { %848 = vmatpush.msrb.mxu3 %v825_v22 }
  0x43   : > { %1009 = vmatpush.msra.mxu0 %v1439_v15 }
  0x44   : > { %1425 = vmatmul.msk.f32.gmra.mxu0 %vm656_vm0, %v1423_v27  ;;  %v823_v27 = vld [vmem:[%s2184_s7 + $0x10] sm:$0xff]  ;;  %849 = vmatpush.msrb.mxu3 %v824_v26 }
  0x46   : > { %850 = vmatpush.msrb.mxu3 %v823_v27  ;;  %v1447_v27 = vld [vmem:[%s2187_s10 + $0x28] sm:$0xff] }
  0x48   : > { %851 = vmatpush.msrb.mxu3 %v822_v30 }
  0x4a   : > { %852 = vmatpush.msrb.mxu3 %v821_v31 }
  0xb9   : > { %v680_v43 = vpop.f32.mrf.mxu0 }
  0xba   : > { %v1893_v44 = vadd.f32 %v1530_v40, %v680_v43 }
  0xbc   : > { %1426 = vmatmul.msk.f32.vlgmr.msra.gmra.mxu1 %vm656_vm0, %v1893_v44 }
  0xc1   : > { %v683_v47 = vpop.f32.mrf.mxu0 }
  0xc2   : > { %v1903_v48 = vadd.f32 %v1530_v40, %v683_v47  ;;  %v921_v47 = vld [vmem:[%s2187_s10 + $0x10] sm:$0xff] }
  0xc3   : > { %946 = vmatpush.msrb.mxu1 %v921_v47  ;;  %v1533_v47 = vld [vmem:[%s2186_s9 + $0x1] ss:$0 sm:$0xff] }
  0xc4   : > { %1427 = vmatmul.msk.f32.gmra.mxu1 %vm656_vm0, %v1903_v48 }
 0x139   : > { %v715_v52 = vpop.f32.mrf.mxu1 }
 0x13a   : > { %v721_v53 = vmul.f32 %v715_v52, %v1918_v51  ;;  %v919_v52 = vld [vmem:[%s2187_s10] sm:$0xff] }
 0x13c   : > { %755 = vmatmul.f32.vlgmr.msra.gmra.mxu2 %v721_v53 }
 0x141   : > { %v718_v55 = vpop.f32.mrf.mxu1 }
 0x142   : > { %v722_v56 = vmul.f32 %v718_v55, %v1921_v54 }
 0x144   : > { %758 = vmatmul.f32.gmra.mxu2 %v722_v56 }
 0x1bf   : > { %v756_v57 = vpop.f32.mrf.mxu2 }
 0x1c0   : > { %v763_v58 = vsel %vm762_vm1, %v756_v57, -inf }
 0x1c1   : > { %764 = vmax.xlane.f32.xlu0 %v763_v58 }
 0x1c7   : > { %v759_v59 = vpop.f32.mrf.mxu2 }
 0x1c8   : > { %v766_v60 = vsel %vm762_vm1, %v759_v59, -inf }
 0x1c9   : > { %767 = vmax.xlane.f32.xlu0 %v766_v60 }
 0x234   : > { %v765_v61 = vpop.xlane.xlu0 %764 }
 0x235   : > { %v769_v62 = vsub.f32 %v756_v57, %v765_v61 }
 0x237   : > { %v771_v63 = vmul.f32 1.442695, %v769_v62 }
 0x239   : > { %1549 = vpow2.f32 %v771_v63 }
 0x23c   : > { %v768_v0 = vpop.xlane.xlu0 %767 }
 0x23d   : > { %v770_v1 = vsub.f32 %v759_v59, %v768_v0 }
 0x23f   : > { %v1550_v2 = vpop.eup %1549  ;;  %v773_v3 = vmul.f32 1.442695, %v770_v1 }
 0x240   : > { %v775_v6 = vsel %vm762_vm1, %v1550_v2, 0.0 }
 0x241   : > { %1551 = vpow2.f32 %v773_v3  ;;  %776 = vadd.xlane.f32.xlu1 %v775_v6  ;;  %v1531_v6 = vld [vmem:[%s2186_s9] ss:$0 sm:$0xff] }
 0x247   : > { %v1552_v7 = vpop.eup %1551 }
 0x248   : > { %v778_v8 = vsel %vm762_vm1, %v1552_v7, 0.0 }
 0x249   : > { %779 = vadd.xlane.f32.xlu1 %v778_v8 }
 0x2b4   : > { %v777_v18 = vpop.xlane.xlu1 %776 }
 0x2b5   : > { %1553 = vrcp.f32 %v777_v18 }
 0x2bb   : > { %v1554_v23 = vpop.eup %1553 }
 0x2bc   : > { %v780_v24 = vpop.xlane.xlu1 %779  ;;  %v783_v25 = vmul.f32 %v1554_v23, %v1550_v2 }
 0x2bd   : > { %1555 = vrcp.f32 %v780_v24  ;;  %v1449_v24 = vld [vmem:[%s2187_s10 + $0x38] sm:$0xff] }
 0x2be   : > { %1429 = vmatmul.msk.f32.vlgmr.msra.gmra.mxu3 %vm762_vm1, %v783_v25  ;;  %v1448_v25 = vld [vmem:[%s2187_s10 + $0x30] sm:$0xff] }
 0x2c3   : > { %v1556_v28 = vpop.eup %1555 }
 0x2c4   : > { %v784_v29 = vmul.f32 %v1556_v28, %v1552_v7 }
 0x2c6   : > { %1430 = vmatmul.msk.f32.gmra.mxu3 %vm762_vm1, %v784_v29  ;;  %v1446_v29 = vld [vmem:[%s2187_s10 + $0x20] sm:$0xff] }
 0x341   : > { %v813_v32 = vpop.f32.mrf.mxu3 }
 0x342   : > { %v819_v33 = vmul.f32 %v813_v32, %v1918_v51 }
 0x344   : > { %853 = vmatmul.f32.vlgmr.msrb.gmra.mxu3 %v819_v33 }
 0x349   : > { %v816_v34 = vpop.f32.mrf.mxu3 }
 0x34a   : > { %v820_v35 = vmul.f32 %v816_v34, %v1921_v54 }
 0x34c   : > { %856 = vmatmul.f32.gmra.mxu3 %v820_v35 }
 0x3c7   : > { %v854_v40 = vpop.f32.mrf.mxu3 }
 0x3c8   : > { %v860_v41 = vadd.f32 %v854_v40, %v1893_v44  ;;  %v920_v44 = vld [vmem:[%s2187_s10 + $0x8] sm:$0xff] }
 0x3c9   : > { %947 = vmatpush.msrb.mxu1 %v920_v44 }
 0x3ca   : > { %v864_v42 = vand.u32 2147483647, %v860_v41  ;;  %v862_v59 = vmax.f32 %v860_v41, 0.0 }
 0x3cb   : > { %948 = vmatpush.msrb.mxu1 %v919_v52  ;;  %v1087_v52 = vld [vmem:[%s2189_s12 + $0x18] sm:$0xff] }
 0x3cc   : > { %v866_v43 = vsub.f32 0.0, %v864_v42  ;;  %1106 = vmatpush.msrb.mxu2 %v1087_v52  ;;  %1485 = vmatpush.msra.mxu3 %v1087_v52 }
 0x3cd   : > { %1045 = vmatpush.msra.mxu1 %v1449_v24  ;;  %v1146_v24 = vld [vmem:[%s2192_s15 + $0x8] sm:$0xff] }
 0x3ce   : > { %v868_v45 = vmul.f32 1.442695, %v866_v43 }
 0x3cf   : > { %v857_v49 = vpop.f32.mrf.mxu3  ;;  %1046 = vmatpush.msra.mxu1 %v1448_v25  ;;  %v1536_v25 = vld [vmem:[%s2190_s13] ss:$0 sm:$0xff] }
 0x3d0   : > { %1557 = vpow2.f32 %v868_v45  ;;  %v861_v50 = vadd.f32 %v857_v49, %v1903_v48 }
 0x3d1   : > { %1047 = vmatpush.msra.mxu1 %v1447_v27 }
 0x3d2   : > { %v865_v51 = vand.u32 2147483647, %v861_v50  ;;  %v863_v0 = vmax.f32 %v861_v50, 0.0 }
 0x3d3   : > { %1048 = vmatpush.msra.mxu1 %v1446_v29 }
 0x3d4   : > { %v867_v53 = vsub.f32 0.0, %v865_v51 }
 0x3d6   : > { %v1558_v54 = vpop.eup %1557  ;;  %v870_v55 = vmul.f32 1.442695, %v867_v53  ;;  %v1086_v53 = vld [vmem:[%s2189_s12 + $0x10] sm:$0xff] }
 0x3d7   : > { %v872_v56 = vadd.f32 1.0, %v1558_v54  ;;  %1107 = vmatpush.msrb.mxu2 %v1086_v53  ;;  %1486 = vmatpush.msra.mxu3 %v1086_v53  ;;  %v1534_v54 = vld [vmem:[%s2188_s11 + $0x1] ss:$0 sm:$0xff] }
 0x3d8   : > { %1559 = vpow2.f32 %v870_v55  ;;  %v1085_v55 = vld [vmem:[%s2189_s12 + $0x8] sm:$0xff] }
 0x3d9   : > { %1561 = vlog2.f32 %v872_v56  ;;  %1108 = vmatpush.msrb.mxu2 %v1085_v55  ;;  %1487 = vmatpush.msra.mxu3 %v1085_v55  ;;  %v1084_v56 = vld [vmem:[%s2189_s12] sm:$0xff] }
 0x3db   : > { %1109 = vmatpush.msrb.mxu2 %v1084_v56  ;;  %1488 = vmatpush.msra.mxu3 %v1084_v56 }
 0x3de   : > { %v1560_v57 = vpop.eup %1559 }
 0x3df   : > { %v1562_v48 = vpop.eup %1561  ;;  %v873_v58 = vadd.f32 1.0, %v1560_v57 }
 0x3e0   : > { %v875_v60 = vmul.f32 0.6931472, %v1562_v48 }
 0x3e1   : > { %1563 = vlog2.f32 %v873_v58 }
 0x3e2   : > { %v878_v61 = vadd.f32 %v875_v60, %v862_v59 }
 0x3e4   : > { %v1431_v62 = vadd.f32 -0.6931472, %v878_v61 }
 0x3e6   : > { %1433 = vmatmul.msk.f32.vlgmr.msrb.gmra.mxu0 %vm656_vm0, %v1431_v62 }
 0x3e7   : > { %v1564_v63 = vpop.eup %1563 }
 0x3e8   : > { %v877_v1 = vmul.f32 0.6931472, %v1564_v63 }
 0x3ea   : > { %v879_v2 = vadd.f32 %v877_v1, %v863_v0 }
 0x3ec   : > { %v1432_v3 = vadd.f32 -0.6931472, %v879_v2 }
 0x3ee   : > { %1434 = vmatmul.msk.f32.gmra.mxu0 %vm656_vm0, %v1432_v3 }
 0x463   : > { %v913_v7 = vpop.f32.mrf.mxu0 }
 0x464   : > { %v914_v8 = vadd.f32 %v1531_v6, %v913_v7 }
 0x466   : > { %1435 = vmatmul.msk.f32.vlgmr.msrb.gmra.mxu1 %vm656_vm0, %v914_v8 }
 0x46b   : > { %v916_v9 = vpop.f32.mrf.mxu0 }
 0x46c   : > { %v917_v10 = vadd.f32 %v1531_v6, %v916_v9 }
 0x46e   : > { %1436 = vmatmul.msk.f32.gmra.mxu1 %vm656_vm0, %v917_v10 }
 0x4e3   : > { %v950_v16 = vpop.f32.mrf.mxu1 }
 0x4e4   : > { %v951_v17 = vadd.f32 %v1532_v13, %v950_v16 }
 0x4e6   : > { %v956_v18 = vadd.f32 %v951_v17, %v860_v41 }
 0x4e8   : > { %v960_v19 = vand.u32 2147483647, %v956_v18  ;;  %v958_v37 = vmax.f32 %v956_v18, 0.0 }
 0x4ea   : > { %v962_v20 = vsub.f32 0.0, %v960_v19 }
 0x4eb   : > { %v953_v21 = vpop.f32.mrf.mxu1 }
 0x4ec   : > { %v964_v22 = vmul.f32 1.442695, %v962_v20  ;;  %v954_v23 = vadd.f32 %v1532_v13, %v953_v21  ;;  %v1535_v20 = vld [vmem:[%s2191_s14] ss:$0 sm:$0xff]  ;;  %v1148_v21 = vld [vmem:[%s2192_s15 + $0x18] sm:$0xff] }
 0x4ed   : > { %1171 = vmatpush.msrb.mxu3 %v1148_v21 }
 0x4ee   : > { %1565 = vpow2.f32 %v964_v22  ;;  %v957_v26 = vadd.f32 %v954_v23, %v861_v50  ;;  %v1147_v22 = vld [vmem:[%s2192_s15 + $0x10] sm:$0xff]  ;;  %v1082_v23 = vmul.f32 %v1535_v20, %v1832_v4  ;;  %v1083_v4 = vmul.f32 %v1535_v20, %v1834_v5 }
 0x4ef   : > { %1172 = vmatpush.msrb.mxu3 %v1147_v22 }
 0x4f0   : > { %v961_v28 = vand.u32 2147483647, %v957_v26  ;;  %v959_v42 = vmax.f32 %v957_v26, 0.0 }
 0x4f1   : > { %1173 = vmatpush.msrb.mxu3 %v1146_v24 }
 0x4f2   : > { %v963_v30 = vsub.f32 0.0, %v961_v28 }
 0x4f4   : > { %v1566_v31 = vpop.eup %1565  ;;  %v966_v32 = vmul.f32 1.442695, %v963_v30 }
 0x4f5   : > { %v968_v33 = vadd.f32 1.0, %v1566_v31 }
 0x4f6   : > { %1567 = vpow2.f32 %v966_v32 }
 0x4f7   : > { %1569 = vlog2.f32 %v968_v33 }
 0x4fc   : > { %v1568_v34 = vpop.eup %1567 }
 0x4fd   : > { %v1570_v35 = vpop.eup %1569  ;;  %v969_v36 = vadd.f32 1.0, %v1568_v34 }
 0x4fe   : > { %v971_v38 = vmul.f32 0.6931472, %v1570_v35  ;;  %v1185_v35 = vld [vmem:[%s2194_s17 + $0x18] sm:$0xff] }
 0x4ff   : > { %1571 = vlog2.f32 %v969_v36  ;;  %v1184_v36 = vld [vmem:[%s2194_s17 + $0x10] sm:$0xff]  ;;  %1208 = vmatpush.msrb.mxu0 %v1185_v35 }
 0x500   : > { %v974_v39 = vadd.f32 %v971_v38, %v958_v37  ;;  %v1183_v38 = vld [vmem:[%s2194_s17 + $0x8] sm:$0xff] }
 0x501   : > { %1209 = vmatpush.msrb.mxu0 %v1184_v36 }
 0x502   : > { %v1437_v40 = vadd.f32 -0.6931472, %v974_v39  ;;  %v1182_v39 = vld [vmem:[%s2194_s17] sm:$0xff] }
 0x503   : > { %1210 = vmatpush.msrb.mxu0 %v1183_v38  ;;  %v1540_v38 = vld [vmem:[%s2195_s18 + $0x1] ss:$0 sm:$0xff] }
 0x504   : > { %1444 = vmatmul.msk.f32.vlgmr.msra.gmra.mxu0 %vm656_vm0, %v1437_v40 }
 0x505   : > { %v1572_v41 = vpop.eup %1571  ;;  %1211 = vmatpush.msrb.mxu0 %v1182_v39 }
 0x506   : > { %v973_v43 = vmul.f32 0.6931472, %v1572_v41 }
 0x508   : > { %v975_v45 = vadd.f32 %v973_v43, %v959_v42 }
 0x50a   : > { %v1438_v46 = vadd.f32 -0.6931472, %v975_v45 }
 0x50c   : > { %1445 = vmatmul.msk.f32.gmra.mxu0 %vm656_vm0, %v1438_v46 }
 0x581   : > { %v1011_v49 = vpop.f32.mrf.mxu0 }
 0x582   : > { %v1012_v50 = vadd.f32 %v1533_v47, %v1011_v49 }
 0x584   : > { %1451 = vmatmul.msk.f32.vlgmr.msra.gmra.mxu1 %vm656_vm0, %v1012_v50 }
 0x589   : > { %v1014_v44 = vpop.f32.mrf.mxu0 }
 0x58a   : > { %v1015_v51 = vadd.f32 %v1533_v47, %v1014_v44 }
 0x58c   : > { %1452 = vmatmul.msk.f32.gmra.mxu1 %vm656_vm0, %v1015_v51 }
 0x601   : > { %v1050_v57 = vpop.f32.mrf.mxu1 }
 0x602   : > { %v1051_v48 = vadd.f32 %v1534_v54, %v1050_v57  ;;  %v1537_v57 = vld [vmem:[%s2193_s16] ss:$0 sm:$0xff] }
 0x604   : > { %v1056_v58 = vadd.f32 %v1051_v48, %v956_v18 }
 0x606   : > { %v1060_v59 = vand.u32 2147483647, %v1056_v58  ;;  %v1058_v11 = vmax.f32 %v1056_v58, 0.0 }
 0x608   : > { %v1062_v60 = vsub.f32 0.0, %v1060_v59 }
 0x609   : > { %v1053_v61 = vpop.f32.mrf.mxu1 }
 0x60a   : > { %v1064_v62 = vmul.f32 1.442695, %v1062_v60  ;;  %v1054_v63 = vadd.f32 %v1534_v54, %v1053_v61  ;;  %v1468_v61 = vld [vmem:[%s2192_s15 + $0x38] sm:$0xff] }
 0x60b   : > { %1269 = vmatpush.msrb.mxu1 %v1468_v61 }
 0x60c   : > { %1573 = vpow2.f32 %v1064_v62  ;;  %v1057_v0 = vadd.f32 %v1054_v63, %v957_v26  ;;  %v1145_v26 = vld [vmem:[%s2192_s15] sm:$0xff]  ;;  %v1467_v62 = vld [vmem:[%s2192_s15 + $0x30] sm:$0xff] }
 0x60d   : > { %1174 = vmatpush.msrb.mxu3 %v1145_v26  ;;  %1270 = vmatpush.msrb.mxu1 %v1467_v62  ;;  %v1538_v63 = vld [vmem:[%s2195_s18] ss:$0 sm:$0xff] }
 0x60e   : > { %v1061_v1 = vand.u32 2147483647, %v1057_v0  ;;  %v1059_v16 = vmax.f32 %v1057_v0, 0.0  ;;  %v1466_v0 = vld [vmem:[%s2192_s15 + $0x28] sm:$0xff] }
 0x60f   : > { %1271 = vmatpush.msrb.mxu1 %v1466_v0 }
 0x610   : > { %v1063_v2 = vsub.f32 0.0, %v1061_v1  ;;  %v1465_v1 = vld [vmem:[%s2192_s15 + $0x20] sm:$0xff] }
 0x611   : > { %1272 = vmatpush.msrb.mxu1 %v1465_v1 }
 0x612   : > { %v1574_v3 = vpop.eup %1573  ;;  %v1066_v6 = vmul.f32 1.442695, %v1063_v2 }
 0x613   : > { %v1068_v7 = vadd.f32 1.0, %v1574_v3 }
 0x614   : > { %1575 = vpow2.f32 %v1066_v6 }
 0x615   : > { %1577 = vlog2.f32 %v1068_v7 }
 0x61a   : > { %v1576_v8 = vpop.eup %1575 }
 0x61b   : > { %v1578_v9 = vpop.eup %1577  ;;  %v1069_v10 = vadd.f32 1.0, %v1576_v8 }
 0x61c   : > { %v1071_v12 = vmul.f32 0.6931472, %v1578_v9 }
 0x61d   : > { %1579 = vlog2.f32 %v1069_v10 }
 0x61e   : > { %v1074_v13 = vadd.f32 %v1071_v12, %v1058_v11  ;;  %v1475_v12 = vld [vmem:[%s2194_s17 + $0x38] sm:$0xff] }
 0x61f   : > { %1308 = vmatpush.msra.mxu2 %v1475_v12 }
 0x620   : > { %v1453_v14 = vadd.f32 -0.6931472, %v1074_v13  ;;  %v1474_v13 = vld [vmem:[%s2194_s17 + $0x30] sm:$0xff] }
 0x621   : > { %1309 = vmatpush.msra.mxu2 %v1474_v13 }
 0x622   : > { %1455 = vmatmul.msk.f32.vlgmr.msrb.gmra.mxu2 %vm656_vm0, %v1453_v14 }
 0x623   : > { %v1580_v15 = vpop.eup %1579 }
 0x624   : > { %v1073_v17 = vmul.f32 0.6931472, %v1580_v15  ;;  %v1473_v15 = vld [vmem:[%s2194_s17 + $0x28] sm:$0xff] }
 0x625   : > { %1310 = vmatpush.msra.mxu2 %v1473_v15 }
 0x626   : > { %v1075_v18 = vadd.f32 %v1073_v17, %v1059_v16 }
 0x628   : > { %v1454_v19 = vadd.f32 -0.6931472, %v1075_v18 }
 0x62a   : > { %1456 = vmatmul.msk.f32.vlgmr.msra.gmra.mxu3 %vm656_vm0, %v1454_v19 }
 0x6a5   : > { %v1111_v27 = vpop.f32.mrf.mxu2 }
 0x6a6   : > { %v1117_v28 = vadd.f32 %v1111_v27, %v1082_v23 }
 0x6a8   : > { %v1123_v29 = vadd.f32 %v1536_v25, %v1117_v28 }
 0x6aa   : > { %v1127_v30 = vand.u32 2147483647, %v1123_v29  ;;  %v1125_v49 = vmax.f32 %v1123_v29, 0.0 }
 0x6ac   : > { %v1129_v31 = vsub.f32 0.0, %v1127_v30 }
 0x6ad   : > { %v1114_v32 = vpop.f32.mrf.mxu3 }
 0x6ae   : > { %v1131_v33 = vmul.f32 1.442695, %v1129_v31  ;;  %v1118_v34 = vadd.f32 %v1114_v32, %v1083_v4  ;;  %v1472_v32 = vld [vmem:[%s2194_s17 + $0x20] sm:$0xff] }
 0x6af   : > { %1311 = vmatpush.msra.mxu2 %v1472_v32 }
 0x6b0   : > { %1581 = vpow2.f32 %v1131_v33  ;;  %v1124_v37 = vadd.f32 %v1536_v25, %v1118_v34  ;;  %v1539_v33 = vld [vmem:[%s2193_s16 + $0x1] ss:$0 sm:$0xff] }
 0x6b2   : > { %v1128_v5 = vand.u32 2147483647, %v1124_v37  ;;  %v1126_v53 = vmax.f32 %v1124_v37, 0.0 }
 0x6b4   : > { %v1130_v40 = vsub.f32 0.0, %v1128_v5 }
 0x6b6   : > { %v1582_v41 = vpop.eup %1581  ;;  %v1133_v42 = vmul.f32 1.442695, %v1130_v40 }
 0x6b7   : > { %v1135_v43 = vadd.f32 1.0, %v1582_v41 }
 0x6b8   : > { %1583 = vpow2.f32 %v1133_v42 }
 0x6b9   : > { %1585 = vlog2.f32 %v1135_v43 }
 0x6be   : > { %v1584_v45 = vpop.eup %1583 }
 0x6bf   : > { %v1586_v46 = vpop.eup %1585  ;;  %v1136_v47 = vadd.f32 1.0, %v1584_v45 }
 0x6c0   : > { %v1138_v50 = vmul.f32 0.6931472, %v1586_v46 }
 0x6c1   : > { %1587 = vlog2.f32 %v1136_v47 }
 0x6c2   : > { %v1141_v44 = vadd.f32 %v1138_v50, %v1125_v49 }
 0x6c4   : > { %v1457_v51 = vadd.f32 -0.6931472, %v1141_v44 }
 0x6c6   : > { %1459 = vmatmul.msk.f32.vlgmr.msrb.gmra.mxu3 %vm656_vm0, %v1457_v51 }
 0x6c7   : > { %v1588_v52 = vpop.eup %1587 }
 0x6c8   : > { %v1140_v54 = vmul.f32 0.6931472, %v1588_v52 }
 0x6ca   : > { %v1142_v55 = vadd.f32 %v1140_v54, %v1126_v53 }
 0x6cc   : > { %v1458_v56 = vadd.f32 -0.6931472, %v1142_v55 }
 0x6ce   : > { %1460 = vmatmul.msk.f32.gmra.mxu3 %vm656_vm0, %v1458_v56 }
 0x749   : > { %v1176_v48 = vpop.f32.mrf.mxu3 }
 0x74a   : > { %v1177_v58 = vadd.f32 %v1537_v57, %v1176_v48 }
 0x74c   : > { %1461 = vmatmul.msk.f32.vlgmr.msrb.gmra.mxu0 %vm656_vm0, %v1177_v58 }
 0x751   : > { %v1179_v59 = vpop.f32.mrf.mxu3 }
 0x752   : > { %v1180_v60 = vadd.f32 %v1537_v57, %v1179_v59 }
 0x754   : > { %1462 = vmatmul.msk.f32.gmra.mxu0 %vm656_vm0, %v1180_v60 }
 0x7c9   : > { %v1213_v2 = vpop.f32.mrf.mxu0 }
 0x7ca   : > { %v1214_v3 = vadd.f32 %v1538_v63, %v1213_v2 }
 0x7cc   : > { %v1219_v6 = vadd.f32 %v1214_v3, %v1123_v29 }
 0x7ce   : > { %v1223_v7 = vand.u32 2147483647, %v1219_v6  ;;  %v1221_v24 = vmax.f32 %v1219_v6, 0.0 }
 0x7d0   : > { %v1225_v8 = vsub.f32 0.0, %v1223_v7 }
 0x7d1   : > { %v1216_v9 = vpop.f32.mrf.mxu0 }
 0x7d2   : > { %v1227_v10 = vmul.f32 1.442695, %v1225_v8  ;;  %v1217_v11 = vadd.f32 %v1538_v63, %v1216_v9 }
 0x7d4   : > { %1589 = vpow2.f32 %v1227_v10  ;;  %v1220_v14 = vadd.f32 %v1217_v11, %v1124_v37 }
 0x7d6   : > { %v1224_v16 = vand.u32 2147483647, %v1220_v14  ;;  %v1222_v29 = vmax.f32 %v1220_v14, 0.0 }
 0x7d8   : > { %v1226_v17 = vsub.f32 0.0, %v1224_v16 }
 0x7da   : > { %v1590_v18 = vpop.eup %1589  ;;  %v1229_v19 = vmul.f32 1.442695, %v1226_v17 }
 0x7db   : > { %v1231_v20 = vadd.f32 1.0, %v1590_v18 }
 0x7dc   : > { %1591 = vpow2.f32 %v1229_v19 }
 0x7dd   : > { %1593 = vlog2.f32 %v1231_v20 }
 0x7e2   : > { %v1592_v21 = vpop.eup %1591 }
 0x7e3   : > { %v1594_v22 = vpop.eup %1593  ;;  %v1232_v23 = vadd.f32 1.0, %v1592_v21 }
 0x7e4   : > { %v1234_v25 = vmul.f32 0.6931472, %v1594_v22 }
 0x7e5   : > { %1595 = vlog2.f32 %v1232_v23 }
 0x7e6   : > { %v1237_v26 = vadd.f32 %v1234_v25, %v1221_v24 }
 0x7e8   : > { %v1463_v27 = vadd.f32 -0.6931472, %v1237_v26 }
 0x7ea   : > { %1470 = vmatmul.msk.f32.vlgmr.msrb.gmra.mxu1 %vm656_vm0, %v1463_v27 }
 0x7eb   : > { %v1596_v28 = vpop.eup %1595 }
 0x7ec   : > { %v1236_v30 = vmul.f32 0.6931472, %v1596_v28 }
 0x7ee   : > { %v1238_v4 = vadd.f32 %v1236_v30, %v1222_v29 }
 0x7f0   : > { %v1464_v31 = vadd.f32 -0.6931472, %v1238_v4 }
 0x7f2   : > { %1471 = vmatmul.msk.f32.gmra.mxu1 %vm656_vm0, %v1464_v31 }
 0x867   : > { %v1274_v34 = vpop.f32.mrf.mxu1 }
 0x868   : > { %v1275_v35 = vadd.f32 %v1539_v33, %v1274_v34 }
 0x86a   : > { %1477 = vmatmul.msk.f32.vlgmr.msra.gmra.mxu2 %vm656_vm0, %v1275_v35 }
 0x86f   : > { %v1277_v36 = vpop.f32.mrf.mxu1 }
 0x870   : > { %v1278_v37 = vadd.f32 %v1539_v33, %v1277_v36 }
 0x872   : > { %1478 = vmatmul.msk.f32.gmra.mxu2 %vm656_vm0, %v1278_v37 }
 0x8ed   : > { %v1313_v5 = vpop.f32.mrf.mxu2 }
 0x8ee   : > { %v1314_v39 = vadd.f32 %v1540_v38, %v1313_v5 }
 0x8f0   : > { %v1319_v40 = vadd.f32 %v1314_v39, %v1219_v6 }
 0x8f2   : > { %1321 = vst.msk [vmem:[%s612_s24] sm:$0xff] %vm656_vm0, %v1319_v40 }
 0x8f5   : > { %v1316_v41 = vpop.f32.mrf.mxu2 }
 0x8f6   : > { %v1317_v42 = vadd.f32 %v1540_v38, %v1316_v41 }
 0x8f8   : > { %v1320_v43 = vadd.f32 %v1317_v42, %v1220_v14 }
 0x8fa   : > { %1322 = vst.msk [vmem:[%s612_s24 + $0x8] sm:$0xff] %vm656_vm0, %v1320_v43 }
 0x8fb   : > { %1624 = shalt.err (!%p1621_p3)
}
 0x8fc   : > { %s1661_s20 = smov 128   ;;  %s1662_s28 = smov 8  }
 0x8fd   : > { %1489 = dma.vmem_to_hbm [thread:$0]  (%p1801_p5), %s1337_s4, 256, %s1339_s22, %s1324_s23, %s1661_s20, %s1661_s20, %s1662_s28  }
 0x8fe PF: > { %s2225_s24 = sld [smem:[#allocation5_spill]]  ;;  %p1495_p4 = scmp.ge.s32.totalorder %s1659_s21, 2 }
 0x900   : > { %p1492_p7 = pnand %p1495_p4, %p1805_p6 }
 0x902   : > { %p1493_p8 = pneg %p1492_p7 }
 0x904   : > { %s1353_s25 = sand.u32 1, %s2225_s24  }
 0x905   : > { %s1354_s26 = scalar_lea.sflag [#allocation3], %s1353_s25 }
 0x906   : > { %1642 = dma.done.wait (%p1493_p8), %s1354_s26, 256  }
 0x907   : > { %1644 = vsyncadd (%p1493_p8), %s1354_s26, 4294967040  ;;  %s2227_s21 = sld [smem:[#allocation7_spill]]  ;;  %s2230_s0 = smov %s1651_s30 }
 0x908   : > { %s2228_s1 = sld [smem:[#allocation6_spill]] }
 0x909   : > { %s2229_s20 = sld [smem:[#allocation8_spill]] }
 0x90d   : > { %p29_p9 = scmp.ge.s32.totalorder %s2227_s21, 4  }
 0x90e   : > { %s2231_s30 = smov %s2228_s1 }
 0x90f   :  { %31 = sbr.rel (!%p29_p9) target bundleno = 10 (0xa), region = 142 }
 0x914   :  { %1360 = vsyncpa [#allocation3], 1 }
 0x915   :  { %1362 = vsyncpa [#allocation3 + $0x1], 1 }

</bundles_post_ra>
